<compile_context>
chip_gen: v6e
topology: v6e:2x2x1
jax: 0.10.0
libtpu: 0.0.40
codegen_flags: <defaults>
</compile_context>

<pallas_src>
import functools

import jax
import jax.numpy as jnp
from jax.experimental import pallas as pl
from jax.experimental.pallas import tpu as pltpu


def _sigmoid(x):
    # sigmoid(x) = 0.5 * (tanh(x/2) + 1): EUP tanh path, no VALU divide.
    return 0.5 * (jnp.tanh(0.5 * x) + 1.0)


def _round_up(n, m):
    return -(-n // m) * m


def lstm_chunk_kernel(x_ref, wih_ref, whh_ref, b_ref, wd_ref, bd_ref, idx_ref,
                      o_ref, h_sc, c_sc, hlast_sc, gx_sc,
                      *, hidden_dim, chunk, batch, carry_state):
    """One grid step = one (batch block, time chunk).

    x_ref   : (Tc, BB, E)  bf16 embeddings for this chunk
    wih_ref : (E, 4H)      bf16 (transposed, gate-pre-scaled PyTorch weight_ih)
    whh_ref : (H, 4H)      bf16 (transposed, gate-pre-scaled PyTorch weight_hh)
    b_ref   : (1, 4H)      f32  gate-pre-scaled (b_ih + b_hh)
    wd_ref  : (H, 1)       f32  dense weight (transposed)
    bd_ref  : (1, 1)       f32  dense bias
    idx_ref : (BB, 1)      int32 per-example last valid time index
    o_ref   : (BB, 1)      f32  output probabilities
    h_sc/c_sc/hlast_sc : (BB, H) f32 recurrent state + captured last hidden
    gx_sc   : (Tc, BB, 4H) bf16 chunk-wide input projection
    """
    c_idx = pl.program_id(1)
    H = hidden_dim

    @pl.when(c_idx == 0)
    def _():
        h_sc[...] = jnp.zeros_like(h_sc)
        c_sc[...] = jnp.zeros_like(c_sc)
        hlast_sc[...] = jnp.zeros_like(hlast_sc)
        o_ref[...] = jnp.zeros_like(o_ref)

    # ---- time-parallel part: one big MXU matmul for the whole chunk ----------
    x_chunk = x_ref[...].reshape(chunk * batch, -1)                 # (Tc*BB, E) bf16
    gx = jnp.dot(x_chunk, wih_ref[...],
                 preferred_element_type=jnp.float32)                # (Tc*BB, 4H) f32
    gx = gx + b_ref[...]
    gx_sc[...] = gx.reshape(chunk, batch, 4 * H).astype(gx_sc.dtype)

    base_t = c_idx * chunk
    whh = whh_ref[...]          # (H, 4H) bf16, loop-invariant
    idx = idx_ref[...]          # (BB, 1) int32, loop-invariant

    # ---- sequential recurrence over the chunk ---------------------------------
    def cell(t, h, c, hlast):
        gates = gx_sc[t].astype(jnp.float32) + jnp.dot(
            h.astype(jnp.bfloat16), whh,
            preferred_element_type=jnp.float32)                     # (BB, 4H) f32
        # i/f/o lanes arrive pre-scaled by 0.5, so a single EUP tanh pass over the
        # packed (BB,4H) tile suffices; sigmoid(z) = 0.5*tanh(z/2)+0.5 per slice.
        th = jnp.tanh(gates)
        i_g = 0.5 * th[:, 0 * H:1 * H] + 0.5
        f_g = 0.5 * th[:, 1 * H:2 * H] + 0.5
        g_g = th[:, 2 * H:3 * H]
        o_g = 0.5 * th[:, 3 * H:4 * H] + 0.5

        c_new = f_g * c + i_g * g_g
        h_new = o_g * jnp.tanh(c_new)

        # capture the hidden state at each example's last valid time step
        sel = idx == (base_t + t)                                   # (BB, 1) bool
        hlast_new = jnp.where(sel, h_new, hlast)
        return h_new, c_new, hlast_new

    unroll = chunk if chunk <= 16 else 8
    if carry_state:
        # state lives in vregs within the chunk; one scratch write-back per chunk
        def step(t, carry):
            return cell(t, *carry)

        h_f, c_f, hl_f = jax.lax.fori_loop(
            0, chunk, step, (h_sc[...], c_sc[...], hlast_sc[...]), unroll=unroll)
        h_sc[...] = h_f
        c_sc[...] = c_f
        hlast_sc[...] = hl_f
    else:
        # large BB*H: keep state in VMEM scratch (avoids vreg spills)
        def step(t, carry):
            h_new, c_new, hl_new = cell(t, h_sc[...], c_sc[...], hlast_sc[...])
            h_sc[...] = h_new
            c_sc[...] = c_new
            hlast_sc[...] = hl_new
            return carry

        jax.lax.fori_loop(0, chunk, step, 0, unroll=unroll)

    # ---- dense head + sigmoid: once, on the final chunk ------------------------
    @pl.when(c_idx == pl.num_programs(1) - 1)
    def _():
        logit = jnp.dot(hlast_sc[...], wd_ref[...],
                        preferred_element_type=jnp.float32) + bd_ref[...]
        o_ref[...] = _sigmoid(logit)


def _pick_time_chunk(T, target):
    """Largest Tc <= target that divides T (avoids padded serial steps)."""
    target = max(1, min(target, T))
    tc = 1
    for cand in range(target, 0, -1):
        if T % cand == 0:
            tc = cand
            break
    if tc < min(8, T):          # pathological (e.g. prime T): accept a padded tail
        tc = target
    return tc


def _vmem_footprint(Tc, BB, E, H):
    """Rough VMEM bytes: double-buffered embeds + gx scratch + weights + state."""
    lane = lambda n: _round_up(n, 128)
    sub = lambda n: _round_up(n, 8)
    four_h = 4 * H
    emb_blk = Tc * sub(BB) * lane(E) * 2              # bf16 input block
    gx = Tc * sub(BB) * lane(four_h) * 2              # bf16 scratch
    weights = (sub(E) + sub(H)) * lane(four_h) * 2    # W_ih^T + W_hh^T (bf16)
    state = 3 * sub(BB) * lane(H) * 4                 # h, c, hlast (f32)
    misc = sub(BB) * 128 * 4 * 4                      # bias/dense/idx/out slack
    return 2 * emb_blk + gx + 2 * weights + state + misc


def lstm_classifier_forward(x, params, hidden_dim, *, time_chunk=32,
                            batch_block=512):
    """Replicates LSTMClassifier.forward for input x of shape (B, T+1) int32."""
    xt = x.T                       # (T+1, B)
    lengths = xt[0, :]             # (B,)
    reviews = xt[1:, :]            # (T, B) token ids
    T, B = reviews.shape
    H = hidden_dim
    H4 = 4 * H

    # Embedding lookup stays in the XLA wrapper (glue); streamed to the kernel
    # as bf16 to halve HBM traffic.
    # TODO(synk): for E < 128, stream embeds batch-on-lanes (T, E, B) (or gather
    # rows in-kernel via scalar-prefetch DMA) to avoid lane padding of the
    # (Tc, BB, E) tile; the current layout keeps the MXU-native 2D reshape.
    embeds = jnp.take(params["embedding"], reviews, axis=0).astype(jnp.bfloat16)
    E = embeds.shape[-1]

    # min(length, 499) - 1, with PyTorch-style negative-index wrap for length==0.
    last_idx = (jnp.minimum(lengths, 499) - 1).astype(jnp.int32)
    last_idx = jnp.where(last_idx < 0, last_idx + T, last_idx)
    # Defensive clamp: PyTorch would raise if a length exceeded min(T, 500);
    # without it the in-kernel capture mask would never fire.
    last_idx = jnp.clip(last_idx, 0, T - 1)

    # ---- tile sizing against the per-generation VMEM budget -------------------
    try:
        vmem_cap = int(getattr(pltpu.get_tpu_info(), "vmem_capacity_bytes"))
    except Exception:
        vmem_cap = 64 * 1024 * 1024
    if vmem_cap < 32 * 1024 * 1024:
        vmem_cap = 64 * 1024 * 1024
    budget = int(vmem_cap * 0.7)

    B_pad = _round_up(B, 8)
    BB = min(batch_block, B_pad)
    if BB == B_pad and B_pad >= 128:
        # keep >= 2 blocks on the "parallel" axis so a 2nd TensorCore (v7x) works
        BB = _round_up(B_pad // 2, 8)
    BB = max(8, _round_up(BB, 8))

    Tc = _pick_time_chunk(T, time_chunk)
    # shrink Tc first (it only amortizes grid overhead), then BB, until it fits
    while _vmem_footprint(Tc, BB, E, H) > budget and (Tc > 8 or BB > 8):
        if Tc > 8:
            Tc = _pick_time_chunk(T, max(8, Tc // 2))
        else:
            BB = max(8, _round_up(max(8, BB // 2), 8))

    B_pad = _round_up(B_pad, BB)
    T_pad = _round_up(T, Tc)

    footprint = _vmem_footprint(Tc, BB, E, H)
    vmem_limit = int(min(vmem_cap * 0.85,
                         max(footprint + footprint // 4, 32 * 1024 * 1024)))

    # state fits comfortably in vregs? then carry it in the fori_loop carry.
    carry_state = (3 * BB * H * 4) <= (128 * 1024)

    embeds = jnp.pad(embeds, ((0, T_pad - T), (0, B_pad - B), (0, 0)))
    last_idx_p = jnp.pad(last_idx, (0, B_pad - B)).reshape(B_pad, 1)

    # ---- parameters: pre-scale i/f/o gate rows by 0.5 (exact power-of-two) so
    # the kernel needs a single tanh pass per step; bf16 for MXU operands.
    gate_scale = jnp.concatenate([
        jnp.full((2 * H,), 0.5, jnp.float32),   # i, f gates (sigmoid)
        jnp.ones((H,), jnp.float32),            # g gate (tanh)
        jnp.full((H,), 0.5, jnp.float32),       # o gate (sigmoid)
    ])
    wih_t = (params["weight_ih"].astype(jnp.float32)
             * gate_scale[:, None]).T.astype(jnp.bfloat16)           # (E, 4H)
    whh_t = (params["weight_hh"].astype(jnp.float32)
             * gate_scale[:, None]).T.astype(jnp.bfloat16)           # (H, 4H)
    bias = ((params["bias_ih"] + params["bias_hh"]).astype(jnp.float32)
            * gate_scale).reshape(1, H4)
    wd_t = params["dense_w"].T.astype(jnp.float32)                   # (H, 1)
    bd = params["dense_b"].astype(jnp.float32).reshape(1, 1)         # (1, 1)

    n_bb = B_pad // BB
    n_chunks = T_pad // Tc
    kernel = functools.partial(lstm_chunk_kernel, hidden_dim=H, chunk=Tc,
                               batch=BB, carry_state=carry_state)

    out = pl.pallas_call(
        kernel,
        out_shape=jax.ShapeDtypeStruct((B_pad, 1), jnp.float32),
        grid_spec=pltpu.PrefetchScalarGridSpec(
            num_scalar_prefetch=0,
            grid=(n_bb, n_chunks),                                   # (parallel, sequential)
            in_specs=[
                pl.BlockSpec((Tc, BB, E), lambda b, c: (c, b, 0)),   # embeds chunk
                pl.BlockSpec((E, H4), lambda b, c: (0, 0)),          # W_ih^T
                pl.BlockSpec((H, H4), lambda b, c: (0, 0)),          # W_hh^T
                pl.BlockSpec((1, H4), lambda b, c: (0, 0)),          # bias
                pl.BlockSpec((H, 1), lambda b, c: (0, 0)),           # dense W^T
                pl.BlockSpec((1, 1), lambda b, c: (0, 0)),           # dense b
                pl.BlockSpec((BB, 1), lambda b, c: (b, 0)),          # last_idx
            ],
            out_specs=pl.BlockSpec((BB, 1), lambda b, c: (b, 0)),
            scratch_shapes=[
                pltpu.VMEM((BB, H), jnp.float32),        # h state
                pltpu.VMEM((BB, H), jnp.float32),        # c state
                pltpu.VMEM((BB, H), jnp.float32),        # captured h_last
                pltpu.VMEM((Tc, BB, H4), jnp.bfloat16),  # chunk input projection
            ],
        ),
        compiler_params=pltpu.CompilerParams(
            dimension_semantics=("parallel", "arbitrary"),
            vmem_limit_bytes=vmem_limit,
        ),
    )(embeds, wih_t, whh_t, bias, wd_t, bd, last_idx_p)

    return out[:B, 0]   # matches out.squeeze() -> (B,)


def lstm_classifier_reference(x, params, hidden_dim):
    """Pure-JAX f32 reference of the PyTorch forward (for sanity checking)."""
    xt = x.T
    lengths = xt[0, :]
    reviews = xt[1:, :]
    T, B = reviews.shape
    H = hidden_dim
    embeds = jnp.take(params["embedding"], reviews, axis=0).astype(jnp.float32)
    wih = params["weight_ih"].astype(jnp.float32)
    whh = params["weight_hh"].astype(jnp.float32)
    b = (params["bias_ih"] + params["bias_hh"]).astype(jnp.float32)
    h = jnp.zeros((B, H), jnp.float32)
    c = jnp.zeros((B, H), jnp.float32)
    hs = []
    for t in range(T):
        g = embeds[t] @ wih.T + h @ whh.T + b
        i = jax.nn.sigmoid(g[:, 0 * H:1 * H])
        f = jax.nn.sigmoid(g[:, 1 * H:2 * H])
        gg = jnp.tanh(g[:, 2 * H:3 * H])
        o = jax.nn.sigmoid(g[:, 3 * H:4 * H])
        c = f * c + i * gg
        h = o * jnp.tanh(c)
        hs.append(h)
    hs = jnp.stack(hs)                                             # (T, B, H)
    idx = jnp.minimum(lengths, 499) - 1
    idx = jnp.where(idx < 0, idx + T, idx)
    h_last = hs[idx, jnp.arange(B)]
    logit = h_last @ params["dense_w"].astype(jnp.float32).T + params["dense_b"]
    return jax.nn.sigmoid(logit[:, 0])


def init_params(key, vocab_size, embedding_dim, hidden_dim):
    ks = jax.random.split(key, 7)
    scale = 1.0 / jnp.sqrt(hidden_dim)
    emb = jax.random.normal(ks[0], (vocab_size, embedding_dim), jnp.float32)
    emb = emb.at[0].set(0.0)  # padding_idx=0 row is zero
    return {
        "embedding": emb,
        "weight_ih": jax.random.uniform(ks[1], (4 * hidden_dim, embedding_dim),
                                        jnp.float32, -scale, scale),
        "weight_hh": jax.random.uniform(ks[2], (4 * hidden_dim, hidden_dim),
                                        jnp.float32, -scale, scale),
        "bias_ih": jax.random.uniform(ks[3], (4 * hidden_dim,), jnp.float32, -scale, scale),
        "bias_hh": jax.random.uniform(ks[4], (4 * hidden_dim,), jnp.float32, -scale, scale),
        "dense_w": jax.random.uniform(ks[5], (1, hidden_dim), jnp.float32, -scale, scale),
        "dense_b": jax.random.uniform(ks[6], (1,), jnp.float32, -scale, scale),
    }


if __name__ == "__main__":
    VOCAB = 50
    EMBED = 32
    HIDDEN = 32
    BATCH = 2
    SEQ = 8

    key = jax.random.PRNGKey(0)
    k_param, k_tok = jax.random.split(key)

    params = init_params(k_param, VOCAB, EMBED, HIDDEN)

    # Build input: (B, 1 + SEQ); column 0 = length, rest = token ids (0 = pad).
    lengths = jnp.array([5, 8], dtype=jnp.int32)
    tokens = jax.random.randint(k_tok, (BATCH, SEQ), 1, VOCAB, dtype=jnp.int32)
    time_ix = jnp.arange(SEQ, dtype=jnp.int32)[None, :]
    tokens = jnp.where(time_ix < lengths[:, None], tokens, 0)   # zero-pad past length
    x = jnp.concatenate([lengths[:, None], tokens], axis=1)     # (2, 9) int32

    out = lstm_classifier_forward(x, params, HIDDEN)
    out = jax.block_until_ready(out)

    ref = jax.block_until_ready(lstm_classifier_reference(x, params, HIDDEN))

    assert out.shape == (BATCH,)
    assert bool(jnp.all((out >= 0.0) & (out <= 1.0)))
    # bf16 matmul inputs / bf16 gx scratch in the kernel vs f32 reference.
    assert bool(jnp.all(jnp.abs(out - ref) < 3e-2)), (out, ref)
    print("KERNEL_OK")
</pallas_src>

<mosaic_0001>
module attributes {stable_mosaic.version = 11 : i64} {
  func.func @lstm_chunk_kernel(%arg0: i32, %arg1: i32, %arg2: memref<8x8x32xbf16, #tpu.memory_space<vmem>>, %arg3: memref<32x128xbf16, #tpu.memory_space<vmem>>, %arg4: memref<32x128xbf16, #tpu.memory_space<vmem>>, %arg5: memref<1x128xf32, #tpu.memory_space<vmem>>, %arg6: memref<32x1xf32, #tpu.memory_space<vmem>>, %arg7: memref<1x1xf32, #tpu.memory_space<vmem>>, %arg8: memref<8x1xi32, #tpu.memory_space<vmem>>, %arg9: memref<8x1xf32, #tpu.memory_space<vmem>>, %arg10: memref<8x32xf32, #tpu.memory_space<vmem>>, %arg11: memref<8x32xf32, #tpu.memory_space<vmem>>, %arg12: memref<8x32xf32, #tpu.memory_space<vmem>>, %arg13: memref<8x8x128xbf16, #tpu.memory_space<vmem>>) attributes {dimension_semantics = [#tpu.dimension_semantics<parallel>, #tpu.dimension_semantics<arbitrary>], iteration_bounds = array<i64: 1, 1>, scalar_prefetch = 0 : i64, scratch_operands = 4 : i64, tpu.core_type = #tpu.core_type<tc>, window_params = [{transform_indices = @transform_0, window_bounds = array<i64: 8, 8, 32>}, {pipeline_mode = #tpu.pipeline_mode<synchronous>, transform_indices = @transform_1, window_bounds = array<i64: 32, 128>}, {pipeline_mode = #tpu.pipeline_mode<synchronous>, transform_indices = @transform_2, window_bounds = array<i64: 32, 128>}, {pipeline_mode = #tpu.pipeline_mode<synchronous>, transform_indices = @transform_3, window_bounds = array<i64: 1, 128>}, {pipeline_mode = #tpu.pipeline_mode<synchronous>, transform_indices = @transform_4, window_bounds = array<i64: 32, 1>}, {pipeline_mode = #tpu.pipeline_mode<synchronous>, transform_indices = @transform_5, window_bounds = array<i64: 1, 1>}, {transform_indices = @transform_6, window_bounds = array<i64: 8, 1>}, {transform_indices = @transform_7, window_bounds = array<i64: 8, 1>}]} {
    %c0_i32 = arith.constant 0 : i32
    %0 = arith.cmpi eq, %arg1, %c0_i32 : i32
    %1 = arith.extui %0 : i1 to i32
    %c0_i32_0 = arith.constant 0 : i32
    %2 = arith.cmpi ne, %1, %c0_i32_0 : i32
    scf.if %2 {
      %cst_102 = arith.constant 0.000000e+00 : f32
      %305 = vector.broadcast %cst_102 : f32 to vector<8x32xf32>
      %c0_103 = arith.constant 0 : index
      %c0_104 = arith.constant 0 : index
      %306 = vector.load %arg10[%c0_103, %c0_104] : memref<8x32xf32, #tpu.memory_space<vmem>>, vector<8x32xf32>
      tpu.vector_store %arg10[%c0_103, %c0_104], %305 {strides = array<i32>} : memref<8x32xf32, #tpu.memory_space<vmem>>, vector<8x32xf32>,
      %cst_105 = arith.constant 0.000000e+00 : f32
      %307 = vector.broadcast %cst_105 : f32 to vector<8x32xf32>
      %c0_106 = arith.constant 0 : index
      %c0_107 = arith.constant 0 : index
      %308 = vector.load %arg11[%c0_106, %c0_107] : memref<8x32xf32, #tpu.memory_space<vmem>>, vector<8x32xf32>
      tpu.vector_store %arg11[%c0_106, %c0_107], %307 {strides = array<i32>} : memref<8x32xf32, #tpu.memory_space<vmem>>, vector<8x32xf32>,
      %cst_108 = arith.constant 0.000000e+00 : f32
      %309 = vector.broadcast %cst_108 : f32 to vector<8x32xf32>
      %c0_109 = arith.constant 0 : index
      %c0_110 = arith.constant 0 : index
      %310 = vector.load %arg12[%c0_109, %c0_110] : memref<8x32xf32, #tpu.memory_space<vmem>>, vector<8x32xf32>
      tpu.vector_store %arg12[%c0_109, %c0_110], %309 {strides = array<i32>} : memref<8x32xf32, #tpu.memory_space<vmem>>, vector<8x32xf32>,
      %cst_111 = arith.constant 0.000000e+00 : f32
      %311 = vector.broadcast %cst_111 : f32 to vector<8x1xf32>
      %c0_112 = arith.constant 0 : index
      %c0_113 = arith.constant 0 : index
      %312 = vector.load %arg9[%c0_112, %c0_113] : memref<8x1xf32, #tpu.memory_space<vmem>>, vector<8x1xf32>
      tpu.vector_store %arg9[%c0_112, %c0_113], %311 {strides = array<i32>} : memref<8x1xf32, #tpu.memory_space<vmem>>, vector<8x1xf32>,
    } else {
    }
    %c0 = arith.constant 0 : index
    %c0_1 = arith.constant 0 : index
    %c0_2 = arith.constant 0 : index
    %3 = vector.load %arg2[%c0, %c0_1, %c0_2] : memref<8x8x32xbf16, #tpu.memory_space<vmem>>, vector<8x8x32xbf16>
    %4 = vector.shape_cast %3 : vector<8x8x32xbf16> to vector<64x32xbf16>
    %c0_3 = arith.constant 0 : index
    %c0_4 = arith.constant 0 : index
    %5 = vector.load %arg3[%c0_3, %c0_4] : memref<32x128xbf16, #tpu.memory_space<vmem>>, vector<32x128xbf16>
    %cst = arith.constant dense<0.000000e+00> : vector<64x128xf32>
    %6 = tpu.matmul %4, %5, %cst {dimension_numbers = #tpu.dot_dimension_numbers<[1], [0], [0], [1], [0, 0, 1, 1], [], []>} : vector<64x32xbf16>, vector<32x128xbf16>, vector<64x128xf32> -> vector<64x128xf32>
    %c0_5 = arith.constant 0 : index
    %c0_6 = arith.constant 0 : index
    %7 = vector.load %arg5[%c0_5, %c0_6] : memref<1x128xf32, #tpu.memory_space<vmem>>, vector<1x128xf32>
    %8 = vector.broadcast %7 : vector<1x128xf32> to vector<64x128xf32>
    %9 = arith.addf %6, %8 : vector<64x128xf32>
    %10 = vector.shape_cast %9 : vector<64x128xf32> to vector<8x8x128xf32>
    %11 = arith.truncf %10 : vector<8x8x128xf32> to vector<8x8x128xbf16>
    %c0_7 = arith.constant 0 : index
    %c0_8 = arith.constant 0 : index
    %c0_9 = arith.constant 0 : index
    %12 = vector.load %arg13[%c0_7, %c0_8, %c0_9] : memref<8x8x128xbf16, #tpu.memory_space<vmem>>, vector<8x8x128xbf16>
    tpu.vector_store %arg13[%c0_7, %c0_8, %c0_9], %11 {strides = array<i32>} : memref<8x8x128xbf16, #tpu.memory_space<vmem>>, vector<8x8x128xbf16>,
    %c8_i32 = arith.constant 8 : i32
    %13 = arith.muli %arg1, %c8_i32 : i32
    %c0_10 = arith.constant 0 : index
    %c0_11 = arith.constant 0 : index
    %14 = vector.load %arg4[%c0_10, %c0_11] : memref<32x128xbf16, #tpu.memory_space<vmem>>, vector<32x128xbf16>
    %c0_12 = arith.constant 0 : index
    %c0_13 = arith.constant 0 : index
    %15 = vector.load %arg8[%c0_12, %c0_13] : memref<8x1xi32, #tpu.memory_space<vmem>>, vector<8x1xi32>
    %c0_14 = arith.constant 0 : index
    %c0_15 = arith.constant 0 : index
    %16 = vector.load %arg10[%c0_14, %c0_15] : memref<8x32xf32, #tpu.memory_space<vmem>>, vector<8x32xf32>
    %c0_16 = arith.constant 0 : index
    %c0_17 = arith.constant 0 : index
    %17 = vector.load %arg11[%c0_16, %c0_17] : memref<8x32xf32, #tpu.memory_space<vmem>>, vector<8x32xf32>
    %c0_18 = arith.constant 0 : index
    %c0_19 = arith.constant 0 : index
    %18 = vector.load %arg12[%c0_18, %c0_19] : memref<8x32xf32, #tpu.memory_space<vmem>>, vector<8x32xf32>
    %c0_i32_20 = arith.constant 0 : i32
    %19 = arith.index_cast %c0_i32_20 : i32 to index
    %c0_21 = arith.constant 0 : index
    %c0_22 = arith.constant 0 : index
    %20 = vector.load %arg13[%19, %c0_21, %c0_22] : memref<8x8x128xbf16, #tpu.memory_space<vmem>>, vector<1x8x128xbf16>
    %21 = vector.shape_cast %20 : vector<1x8x128xbf16> to vector<8x128xbf16>
    %22 = arith.extf %21 : vector<8x128xbf16> to vector<8x128xf32>
    %23 = arith.truncf %16 : vector<8x32xf32> to vector<8x32xbf16>
    %cst_23 = arith.constant dense<0.000000e+00> : vector<8x128xf32>
    %24 = tpu.matmul %23, %14, %cst_23 {dimension_numbers = #tpu.dot_dimension_numbers<[1], [0], [0], [1], [0, 0, 1, 1], [], []>} : vector<8x32xbf16>, vector<32x128xbf16>, vector<8x128xf32> -> vector<8x128xf32>
    %25 = arith.addf %22, %24 : vector<8x128xf32>
    %26 = math.tanh %25 : vector<8x128xf32>
    %27 = vector.extract_strided_slice %26 {offsets = [0, 0], sizes = [8, 32], strides = [1, 1]} : vector<8x128xf32> to vector<8x32xf32>
    %cst_24 = arith.constant 5.000000e-01 : f32
    %28 = vector.broadcast %cst_24 : f32 to vector<8x32xf32>
    %29 = arith.mulf %28, %27 : vector<8x32xf32>
    %cst_25 = arith.constant 5.000000e-01 : f32
    %30 = vector.broadcast %cst_25 : f32 to vector<8x32xf32>
    %31 = arith.addf %29, %30 : vector<8x32xf32>
    %32 = vector.extract_strided_slice %26 {offsets = [0, 32], sizes = [8, 32], strides = [1, 1]} : vector<8x128xf32> to vector<8x32xf32>
    %cst_26 = arith.constant 5.000000e-01 : f32
    %33 = vector.broadcast %cst_26 : f32 to vector<8x32xf32>
    %34 = arith.mulf %33, %32 : vector<8x32xf32>
    %cst_27 = arith.constant 5.000000e-01 : f32
    %35 = vector.broadcast %cst_27 : f32 to vector<8x32xf32>
    %36 = arith.addf %34, %35 : vector<8x32xf32>
    %37 = vector.extract_strided_slice %26 {offsets = [0, 64], sizes = [8, 32], strides = [1, 1]} : vector<8x128xf32> to vector<8x32xf32>
    %38 = vector.extract_strided_slice %26 {offsets = [0, 96], sizes = [8, 32], strides = [1, 1]} : vector<8x128xf32> to vector<8x32xf32>
    %cst_28 = arith.constant 5.000000e-01 : f32
    %39 = vector.broadcast %cst_28 : f32 to vector<8x32xf32>
    %40 = arith.mulf %39, %38 : vector<8x32xf32>
    %cst_29 = arith.constant 5.000000e-01 : f32
    %41 = vector.broadcast %cst_29 : f32 to vector<8x32xf32>
    %42 = arith.addf %40, %41 : vector<8x32xf32>
    %43 = arith.mulf %36, %17 : vector<8x32xf32>
    %44 = arith.mulf %31, %37 : vector<8x32xf32>
    %45 = arith.addf %43, %44 : vector<8x32xf32>
    %46 = math.tanh %45 : vector<8x32xf32>
    %47 = arith.mulf %42, %46 : vector<8x32xf32>
    %48 = arith.addi %13, %c0_i32_20 : i32
    %49 = vector.broadcast %48 : i32 to vector<8x1xi32>
    %50 = arith.cmpi eq, %15, %49 : vector<8x1xi32>
    %51 = vector.shape_cast %50 : vector<8x1xi1> to vector<8x1xi1>
    %52 = vector.broadcast %51 : vector<8x1xi1> to vector<8x32xi1>
    %53 = arith.select %52, %47, %18 : vector<8x32xi1>, vector<8x32xf32>
    %c1_i32 = arith.constant 1 : i32
    %54 = arith.index_cast %c1_i32 : i32 to index
    %c0_30 = arith.constant 0 : index
    %c0_31 = arith.constant 0 : index
    %55 = vector.load %arg13[%54, %c0_30, %c0_31] : memref<8x8x128xbf16, #tpu.memory_space<vmem>>, vector<1x8x128xbf16>
    %56 = vector.shape_cast %55 : vector<1x8x128xbf16> to vector<8x128xbf16>
    %57 = arith.extf %56 : vector<8x128xbf16> to vector<8x128xf32>
    %58 = arith.truncf %47 : vector<8x32xf32> to vector<8x32xbf16>
    %cst_32 = arith.constant dense<0.000000e+00> : vector<8x128xf32>
    %59 = tpu.matmul %58, %14, %cst_32 {dimension_numbers = #tpu.dot_dimension_numbers<[1], [0], [0], [1], [0, 0, 1, 1], [], []>} : vector<8x32xbf16>, vector<32x128xbf16>, vector<8x128xf32> -> vector<8x128xf32>
    %60 = arith.addf %57, %59 : vector<8x128xf32>
    %61 = math.tanh %60 : vector<8x128xf32>
    %62 = vector.extract_strided_slice %61 {offsets = [0, 0], sizes = [8, 32], strides = [1, 1]} : vector<8x128xf32> to vector<8x32xf32>
    %cst_33 = arith.constant 5.000000e-01 : f32
    %63 = vector.broadcast %cst_33 : f32 to vector<8x32xf32>
    %64 = arith.mulf %63, %62 : vector<8x32xf32>
    %cst_34 = arith.constant 5.000000e-01 : f32
    %65 = vector.broadcast %cst_34 : f32 to vector<8x32xf32>
    %66 = arith.addf %64, %65 : vector<8x32xf32>
    %67 = vector.extract_strided_slice %61 {offsets = [0, 32], sizes = [8, 32], strides = [1, 1]} : vector<8x128xf32> to vector<8x32xf32>
    %cst_35 = arith.constant 5.000000e-01 : f32
    %68 = vector.broadcast %cst_35 : f32 to vector<8x32xf32>
    %69 = arith.mulf %68, %67 : vector<8x32xf32>
    %cst_36 = arith.constant 5.000000e-01 : f32
    %70 = vector.broadcast %cst_36 : f32 to vector<8x32xf32>
    %71 = arith.addf %69, %70 : vector<8x32xf32>
    %72 = vector.extract_strided_slice %61 {offsets = [0, 64], sizes = [8, 32], strides = [1, 1]} : vector<8x128xf32> to vector<8x32xf32>
    %73 = vector.extract_strided_slice %61 {offsets = [0, 96], sizes = [8, 32], strides = [1, 1]} : vector<8x128xf32> to vector<8x32xf32>
    %cst_37 = arith.constant 5.000000e-01 : f32
    %74 = vector.broadcast %cst_37 : f32 to vector<8x32xf32>
    %75 = arith.mulf %74, %73 : vector<8x32xf32>
    %cst_38 = arith.constant 5.000000e-01 : f32
    %76 = vector.broadcast %cst_38 : f32 to vector<8x32xf32>
    %77 = arith.addf %75, %76 : vector<8x32xf32>
    %78 = arith.mulf %71, %45 : vector<8x32xf32>
    %79 = arith.mulf %66, %72 : vector<8x32xf32>
    %80 = arith.addf %78, %79 : vector<8x32xf32>
    %81 = math.tanh %80 : vector<8x32xf32>
    %82 = arith.mulf %77, %81 : vector<8x32xf32>
    %83 = arith.addi %13, %c1_i32 : i32
    %84 = vector.broadcast %83 : i32 to vector<8x1xi32>
    %85 = arith.cmpi eq, %15, %84 : vector<8x1xi32>
    %86 = vector.shape_cast %85 : vector<8x1xi1> to vector<8x1xi1>
    %87 = vector.broadcast %86 : vector<8x1xi1> to vector<8x32xi1>
    %88 = arith.select %87, %82, %53 : vector<8x32xi1>, vector<8x32xf32>
    %c2_i32 = arith.constant 2 : i32
    %89 = arith.index_cast %c2_i32 : i32 to index
    %c0_39 = arith.constant 0 : index
    %c0_40 = arith.constant 0 : index
    %90 = vector.load %arg13[%89, %c0_39, %c0_40] : memref<8x8x128xbf16, #tpu.memory_space<vmem>>, vector<1x8x128xbf16>
    %91 = vector.shape_cast %90 : vector<1x8x128xbf16> to vector<8x128xbf16>
    %92 = arith.extf %91 : vector<8x128xbf16> to vector<8x128xf32>
    %93 = arith.truncf %82 : vector<8x32xf32> to vector<8x32xbf16>
    %cst_41 = arith.constant dense<0.000000e+00> : vector<8x128xf32>
    %94 = tpu.matmul %93, %14, %cst_41 {dimension_numbers = #tpu.dot_dimension_numbers<[1], [0], [0], [1], [0, 0, 1, 1], [], []>} : vector<8x32xbf16>, vector<32x128xbf16>, vector<8x128xf32> -> vector<8x128xf32>
    %95 = arith.addf %92, %94 : vector<8x128xf32>
    %96 = math.tanh %95 : vector<8x128xf32>
    %97 = vector.extract_strided_slice %96 {offsets = [0, 0], sizes = [8, 32], strides = [1, 1]} : vector<8x128xf32> to vector<8x32xf32>
    %cst_42 = arith.constant 5.000000e-01 : f32
    %98 = vector.broadcast %cst_42 : f32 to vector<8x32xf32>
    %99 = arith.mulf %98, %97 : vector<8x32xf32>
    %cst_43 = arith.constant 5.000000e-01 : f32
    %100 = vector.broadcast %cst_43 : f32 to vector<8x32xf32>
    %101 = arith.addf %99, %100 : vector<8x32xf32>
    %102 = vector.extract_strided_slice %96 {offsets = [0, 32], sizes = [8, 32], strides = [1, 1]} : vector<8x128xf32> to vector<8x32xf32>
    %cst_44 = arith.constant 5.000000e-01 : f32
    %103 = vector.broadcast %cst_44 : f32 to vector<8x32xf32>
    %104 = arith.mulf %103, %102 : vector<8x32xf32>
    %cst_45 = arith.constant 5.000000e-01 : f32
    %105 = vector.broadcast %cst_45 : f32 to vector<8x32xf32>
    %106 = arith.addf %104, %105 : vector<8x32xf32>
    %107 = vector.extract_strided_slice %96 {offsets = [0, 64], sizes = [8, 32], strides = [1, 1]} : vector<8x128xf32> to vector<8x32xf32>
    %108 = vector.extract_strided_slice %96 {offsets = [0, 96], sizes = [8, 32], strides = [1, 1]} : vector<8x128xf32> to vector<8x32xf32>
    %cst_46 = arith.constant 5.000000e-01 : f32
    %109 = vector.broadcast %cst_46 : f32 to vector<8x32xf32>
    %110 = arith.mulf %109, %108 : vector<8x32xf32>
    %cst_47 = arith.constant 5.000000e-01 : f32
    %111 = vector.broadcast %cst_47 : f32 to vector<8x32xf32>
    %112 = arith.addf %110, %111 : vector<8x32xf32>
    %113 = arith.mulf %106, %80 : vector<8x32xf32>
    %114 = arith.mulf %101, %107 : vector<8x32xf32>
    %115 = arith.addf %113, %114 : vector<8x32xf32>
    %116 = math.tanh %115 : vector<8x32xf32>
    %117 = arith.mulf %112, %116 : vector<8x32xf32>
    %118 = arith.addi %13, %c2_i32 : i32
    %119 = vector.broadcast %118 : i32 to vector<8x1xi32>
    %120 = arith.cmpi eq, %15, %119 : vector<8x1xi32>
    %121 = vector.shape_cast %120 : vector<8x1xi1> to vector<8x1xi1>
    %122 = vector.broadcast %121 : vector<8x1xi1> to vector<8x32xi1>
    %123 = arith.select %122, %117, %88 : vector<8x32xi1>, vector<8x32xf32>
    %c3_i32 = arith.constant 3 : i32
    %124 = arith.index_cast %c3_i32 : i32 to index
    %c0_48 = arith.constant 0 : index
    %c0_49 = arith.constant 0 : index
    %125 = vector.load %arg13[%124, %c0_48, %c0_49] : memref<8x8x128xbf16, #tpu.memory_space<vmem>>, vector<1x8x128xbf16>
    %126 = vector.shape_cast %125 : vector<1x8x128xbf16> to vector<8x128xbf16>
    %127 = arith.extf %126 : vector<8x128xbf16> to vector<8x128xf32>
    %128 = arith.truncf %117 : vector<8x32xf32> to vector<8x32xbf16>
    %cst_50 = arith.constant dense<0.000000e+00> : vector<8x128xf32>
    %129 = tpu.matmul %128, %14, %cst_50 {dimension_numbers = #tpu.dot_dimension_numbers<[1], [0], [0], [1], [0, 0, 1, 1], [], []>} : vector<8x32xbf16>, vector<32x128xbf16>, vector<8x128xf32> -> vector<8x128xf32>
    %130 = arith.addf %127, %129 : vector<8x128xf32>
    %131 = math.tanh %130 : vector<8x128xf32>
    %132 = vector.extract_strided_slice %131 {offsets = [0, 0], sizes = [8, 32], strides = [1, 1]} : vector<8x128xf32> to vector<8x32xf32>
    %cst_51 = arith.constant 5.000000e-01 : f32
    %133 = vector.broadcast %cst_51 : f32 to vector<8x32xf32>
    %134 = arith.mulf %133, %132 : vector<8x32xf32>
    %cst_52 = arith.constant 5.000000e-01 : f32
    %135 = vector.broadcast %cst_52 : f32 to vector<8x32xf32>
    %136 = arith.addf %134, %135 : vector<8x32xf32>
    %137 = vector.extract_strided_slice %131 {offsets = [0, 32], sizes = [8, 32], strides = [1, 1]} : vector<8x128xf32> to vector<8x32xf32>
    %cst_53 = arith.constant 5.000000e-01 : f32
    %138 = vector.broadcast %cst_53 : f32 to vector<8x32xf32>
    %139 = arith.mulf %138, %137 : vector<8x32xf32>
    %cst_54 = arith.constant 5.000000e-01 : f32
    %140 = vector.broadcast %cst_54 : f32 to vector<8x32xf32>
    %141 = arith.addf %139, %140 : vector<8x32xf32>
    %142 = vector.extract_strided_slice %131 {offsets = [0, 64], sizes = [8, 32], strides = [1, 1]} : vector<8x128xf32> to vector<8x32xf32>
    %143 = vector.extract_strided_slice %131 {offsets = [0, 96], sizes = [8, 32], strides = [1, 1]} : vector<8x128xf32> to vector<8x32xf32>
    %cst_55 = arith.constant 5.000000e-01 : f32
    %144 = vector.broadcast %cst_55 : f32 to vector<8x32xf32>
    %145 = arith.mulf %144, %143 : vector<8x32xf32>
    %cst_56 = arith.constant 5.000000e-01 : f32
    %146 = vector.broadcast %cst_56 : f32 to vector<8x32xf32>
    %147 = arith.addf %145, %146 : vector<8x32xf32>
    %148 = arith.mulf %141, %115 : vector<8x32xf32>
    %149 = arith.mulf %136, %142 : vector<8x32xf32>
    %150 = arith.addf %148, %149 : vector<8x32xf32>
    %151 = math.tanh %150 : vector<8x32xf32>
    %152 = arith.mulf %147, %151 : vector<8x32xf32>
    %153 = arith.addi %13, %c3_i32 : i32
    %154 = vector.broadcast %153 : i32 to vector<8x1xi32>
    %155 = arith.cmpi eq, %15, %154 : vector<8x1xi32>
    %156 = vector.shape_cast %155 : vector<8x1xi1> to vector<8x1xi1>
    %157 = vector.broadcast %156 : vector<8x1xi1> to vector<8x32xi1>
    %158 = arith.select %157, %152, %123 : vector<8x32xi1>, vector<8x32xf32>
    %c4_i32 = arith.constant 4 : i32
    %159 = arith.index_cast %c4_i32 : i32 to index
    %c0_57 = arith.constant 0 : index
    %c0_58 = arith.constant 0 : index
    %160 = vector.load %arg13[%159, %c0_57, %c0_58] : memref<8x8x128xbf16, #tpu.memory_space<vmem>>, vector<1x8x128xbf16>
    %161 = vector.shape_cast %160 : vector<1x8x128xbf16> to vector<8x128xbf16>
    %162 = arith.extf %161 : vector<8x128xbf16> to vector<8x128xf32>
    %163 = arith.truncf %152 : vector<8x32xf32> to vector<8x32xbf16>
    %cst_59 = arith.constant dense<0.000000e+00> : vector<8x128xf32>
    %164 = tpu.matmul %163, %14, %cst_59 {dimension_numbers = #tpu.dot_dimension_numbers<[1], [0], [0], [1], [0, 0, 1, 1], [], []>} : vector<8x32xbf16>, vector<32x128xbf16>, vector<8x128xf32> -> vector<8x128xf32>
    %165 = arith.addf %162, %164 : vector<8x128xf32>
    %166 = math.tanh %165 : vector<8x128xf32>
    %167 = vector.extract_strided_slice %166 {offsets = [0, 0], sizes = [8, 32], strides = [1, 1]} : vector<8x128xf32> to vector<8x32xf32>
    %cst_60 = arith.constant 5.000000e-01 : f32
    %168 = vector.broadcast %cst_60 : f32 to vector<8x32xf32>
    %169 = arith.mulf %168, %167 : vector<8x32xf32>
    %cst_61 = arith.constant 5.000000e-01 : f32
    %170 = vector.broadcast %cst_61 : f32 to vector<8x32xf32>
    %171 = arith.addf %169, %170 : vector<8x32xf32>
    %172 = vector.extract_strided_slice %166 {offsets = [0, 32], sizes = [8, 32], strides = [1, 1]} : vector<8x128xf32> to vector<8x32xf32>
    %cst_62 = arith.constant 5.000000e-01 : f32
    %173 = vector.broadcast %cst_62 : f32 to vector<8x32xf32>
    %174 = arith.mulf %173, %172 : vector<8x32xf32>
    %cst_63 = arith.constant 5.000000e-01 : f32
    %175 = vector.broadcast %cst_63 : f32 to vector<8x32xf32>
    %176 = arith.addf %174, %175 : vector<8x32xf32>
    %177 = vector.extract_strided_slice %166 {offsets = [0, 64], sizes = [8, 32], strides = [1, 1]} : vector<8x128xf32> to vector<8x32xf32>
    %178 = vector.extract_strided_slice %166 {offsets = [0, 96], sizes = [8, 32], strides = [1, 1]} : vector<8x128xf32> to vector<8x32xf32>
    %cst_64 = arith.constant 5.000000e-01 : f32
    %179 = vector.broadcast %cst_64 : f32 to vector<8x32xf32>
    %180 = arith.mulf %179, %178 : vector<8x32xf32>
    %cst_65 = arith.constant 5.000000e-01 : f32
    %181 = vector.broadcast %cst_65 : f32 to vector<8x32xf32>
    %182 = arith.addf %180, %181 : vector<8x32xf32>
    %183 = arith.mulf %176, %150 : vector<8x32xf32>
    %184 = arith.mulf %171, %177 : vector<8x32xf32>
    %185 = arith.addf %183, %184 : vector<8x32xf32>
    %186 = math.tanh %185 : vector<8x32xf32>
    %187 = arith.mulf %182, %186 : vector<8x32xf32>
    %188 = arith.addi %13, %c4_i32 : i32
    %189 = vector.broadcast %188 : i32 to vector<8x1xi32>
    %190 = arith.cmpi eq, %15, %189 : vector<8x1xi32>
    %191 = vector.shape_cast %190 : vector<8x1xi1> to vector<8x1xi1>
    %192 = vector.broadcast %191 : vector<8x1xi1> to vector<8x32xi1>
    %193 = arith.select %192, %187, %158 : vector<8x32xi1>, vector<8x32xf32>
    %c5_i32 = arith.constant 5 : i32
    %194 = arith.index_cast %c5_i32 : i32 to index
    %c0_66 = arith.constant 0 : index
    %c0_67 = arith.constant 0 : index
    %195 = vector.load %arg13[%194, %c0_66, %c0_67] : memref<8x8x128xbf16, #tpu.memory_space<vmem>>, vector<1x8x128xbf16>
    %196 = vector.shape_cast %195 : vector<1x8x128xbf16> to vector<8x128xbf16>
    %197 = arith.extf %196 : vector<8x128xbf16> to vector<8x128xf32>
    %198 = arith.truncf %187 : vector<8x32xf32> to vector<8x32xbf16>
    %cst_68 = arith.constant dense<0.000000e+00> : vector<8x128xf32>
    %199 = tpu.matmul %198, %14, %cst_68 {dimension_numbers = #tpu.dot_dimension_numbers<[1], [0], [0], [1], [0, 0, 1, 1], [], []>} : vector<8x32xbf16>, vector<32x128xbf16>, vector<8x128xf32> -> vector<8x128xf32>
    %200 = arith.addf %197, %199 : vector<8x128xf32>
    %201 = math.tanh %200 : vector<8x128xf32>
    %202 = vector.extract_strided_slice %201 {offsets = [0, 0], sizes = [8, 32], strides = [1, 1]} : vector<8x128xf32> to vector<8x32xf32>
    %cst_69 = arith.constant 5.000000e-01 : f32
    %203 = vector.broadcast %cst_69 : f32 to vector<8x32xf32>
    %204 = arith.mulf %203, %202 : vector<8x32xf32>
    %cst_70 = arith.constant 5.000000e-01 : f32
    %205 = vector.broadcast %cst_70 : f32 to vector<8x32xf32>
    %206 = arith.addf %204, %205 : vector<8x32xf32>
    %207 = vector.extract_strided_slice %201 {offsets = [0, 32], sizes = [8, 32], strides = [1, 1]} : vector<8x128xf32> to vector<8x32xf32>
    %cst_71 = arith.constant 5.000000e-01 : f32
    %208 = vector.broadcast %cst_71 : f32 to vector<8x32xf32>
    %209 = arith.mulf %208, %207 : vector<8x32xf32>
    %cst_72 = arith.constant 5.000000e-01 : f32
    %210 = vector.broadcast %cst_72 : f32 to vector<8x32xf32>
    %211 = arith.addf %209, %210 : vector<8x32xf32>
    %212 = vector.extract_strided_slice %201 {offsets = [0, 64], sizes = [8, 32], strides = [1, 1]} : vector<8x128xf32> to vector<8x32xf32>
    %213 = vector.extract_strided_slice %201 {offsets = [0, 96], sizes = [8, 32], strides = [1, 1]} : vector<8x128xf32> to vector<8x32xf32>
    %cst_73 = arith.constant 5.000000e-01 : f32
    %214 = vector.broadcast %cst_73 : f32 to vector<8x32xf32>
    %215 = arith.mulf %214, %213 : vector<8x32xf32>
    %cst_74 = arith.constant 5.000000e-01 : f32
    %216 = vector.broadcast %cst_74 : f32 to vector<8x32xf32>
    %217 = arith.addf %215, %216 : vector<8x32xf32>
    %218 = arith.mulf %211, %185 : vector<8x32xf32>
    %219 = arith.mulf %206, %212 : vector<8x32xf32>
    %220 = arith.addf %218, %219 : vector<8x32xf32>
    %221 = math.tanh %220 : vector<8x32xf32>
    %222 = arith.mulf %217, %221 : vector<8x32xf32>
    %223 = arith.addi %13, %c5_i32 : i32
    %224 = vector.broadcast %223 : i32 to vector<8x1xi32>
    %225 = arith.cmpi eq, %15, %224 : vector<8x1xi32>
    %226 = vector.shape_cast %225 : vector<8x1xi1> to vector<8x1xi1>
    %227 = vector.broadcast %226 : vector<8x1xi1> to vector<8x32xi1>
    %228 = arith.select %227, %222, %193 : vector<8x32xi1>, vector<8x32xf32>
    %c6_i32 = arith.constant 6 : i32
    %229 = arith.index_cast %c6_i32 : i32 to index
    %c0_75 = arith.constant 0 : index
    %c0_76 = arith.constant 0 : index
    %230 = vector.load %arg13[%229, %c0_75, %c0_76] : memref<8x8x128xbf16, #tpu.memory_space<vmem>>, vector<1x8x128xbf16>
    %231 = vector.shape_cast %230 : vector<1x8x128xbf16> to vector<8x128xbf16>
    %232 = arith.extf %231 : vector<8x128xbf16> to vector<8x128xf32>
    %233 = arith.truncf %222 : vector<8x32xf32> to vector<8x32xbf16>
    %cst_77 = arith.constant dense<0.000000e+00> : vector<8x128xf32>
    %234 = tpu.matmul %233, %14, %cst_77 {dimension_numbers = #tpu.dot_dimension_numbers<[1], [0], [0], [1], [0, 0, 1, 1], [], []>} : vector<8x32xbf16>, vector<32x128xbf16>, vector<8x128xf32> -> vector<8x128xf32>
    %235 = arith.addf %232, %234 : vector<8x128xf32>
    %236 = math.tanh %235 : vector<8x128xf32>
    %237 = vector.extract_strided_slice %236 {offsets = [0, 0], sizes = [8, 32], strides = [1, 1]} : vector<8x128xf32> to vector<8x32xf32>
    %cst_78 = arith.constant 5.000000e-01 : f32
    %238 = vector.broadcast %cst_78 : f32 to vector<8x32xf32>
    %239 = arith.mulf %238, %237 : vector<8x32xf32>
    %cst_79 = arith.constant 5.000000e-01 : f32
    %240 = vector.broadcast %cst_79 : f32 to vector<8x32xf32>
    %241 = arith.addf %239, %240 : vector<8x32xf32>
    %242 = vector.extract_strided_slice %236 {offsets = [0, 32], sizes = [8, 32], strides = [1, 1]} : vector<8x128xf32> to vector<8x32xf32>
    %cst_80 = arith.constant 5.000000e-01 : f32
    %243 = vector.broadcast %cst_80 : f32 to vector<8x32xf32>
    %244 = arith.mulf %243, %242 : vector<8x32xf32>
    %cst_81 = arith.constant 5.000000e-01 : f32
    %245 = vector.broadcast %cst_81 : f32 to vector<8x32xf32>
    %246 = arith.addf %244, %245 : vector<8x32xf32>
    %247 = vector.extract_strided_slice %236 {offsets = [0, 64], sizes = [8, 32], strides = [1, 1]} : vector<8x128xf32> to vector<8x32xf32>
    %248 = vector.extract_strided_slice %236 {offsets = [0, 96], sizes = [8, 32], strides = [1, 1]} : vector<8x128xf32> to vector<8x32xf32>
    %cst_82 = arith.constant 5.000000e-01 : f32
    %249 = vector.broadcast %cst_82 : f32 to vector<8x32xf32>
    %250 = arith.mulf %249, %248 : vector<8x32xf32>
    %cst_83 = arith.constant 5.000000e-01 : f32
    %251 = vector.broadcast %cst_83 : f32 to vector<8x32xf32>
    %252 = arith.addf %250, %251 : vector<8x32xf32>
    %253 = arith.mulf %246, %220 : vector<8x32xf32>
    %254 = arith.mulf %241, %247 : vector<8x32xf32>
    %255 = arith.addf %253, %254 : vector<8x32xf32>
    %256 = math.tanh %255 : vector<8x32xf32>
    %257 = arith.mulf %252, %256 : vector<8x32xf32>
    %258 = arith.addi %13, %c6_i32 : i32
    %259 = vector.broadcast %258 : i32 to vector<8x1xi32>
    %260 = arith.cmpi eq, %15, %259 : vector<8x1xi32>
    %261 = vector.shape_cast %260 : vector<8x1xi1> to vector<8x1xi1>
    %262 = vector.broadcast %261 : vector<8x1xi1> to vector<8x32xi1>
    %263 = arith.select %262, %257, %228 : vector<8x32xi1>, vector<8x32xf32>
    %c7_i32 = arith.constant 7 : i32
    %264 = arith.index_cast %c7_i32 : i32 to index
    %c0_84 = arith.constant 0 : index
    %c0_85 = arith.constant 0 : index
    %265 = vector.load %arg13[%264, %c0_84, %c0_85] : memref<8x8x128xbf16, #tpu.memory_space<vmem>>, vector<1x8x128xbf16>
    %266 = vector.shape_cast %265 : vector<1x8x128xbf16> to vector<8x128xbf16>
    %267 = arith.extf %266 : vector<8x128xbf16> to vector<8x128xf32>
    %268 = arith.truncf %257 : vector<8x32xf32> to vector<8x32xbf16>
    %cst_86 = arith.constant dense<0.000000e+00> : vector<8x128xf32>
    %269 = tpu.matmul %268, %14, %cst_86 {dimension_numbers = #tpu.dot_dimension_numbers<[1], [0], [0], [1], [0, 0, 1, 1], [], []>} : vector<8x32xbf16>, vector<32x128xbf16>, vector<8x128xf32> -> vector<8x128xf32>
    %270 = arith.addf %267, %269 : vector<8x128xf32>
    %271 = math.tanh %270 : vector<8x128xf32>
    %272 = vector.extract_strided_slice %271 {offsets = [0, 0], sizes = [8, 32], strides = [1, 1]} : vector<8x128xf32> to vector<8x32xf32>
    %cst_87 = arith.constant 5.000000e-01 : f32
    %273 = vector.broadcast %cst_87 : f32 to vector<8x32xf32>
    %274 = arith.mulf %273, %272 : vector<8x32xf32>
    %cst_88 = arith.constant 5.000000e-01 : f32
    %275 = vector.broadcast %cst_88 : f32 to vector<8x32xf32>
    %276 = arith.addf %274, %275 : vector<8x32xf32>
    %277 = vector.extract_strided_slice %271 {offsets = [0, 32], sizes = [8, 32], strides = [1, 1]} : vector<8x128xf32> to vector<8x32xf32>
    %cst_89 = arith.constant 5.000000e-01 : f32
    %278 = vector.broadcast %cst_89 : f32 to vector<8x32xf32>
    %279 = arith.mulf %278, %277 : vector<8x32xf32>
    %cst_90 = arith.constant 5.000000e-01 : f32
    %280 = vector.broadcast %cst_90 : f32 to vector<8x32xf32>
    %281 = arith.addf %279, %280 : vector<8x32xf32>
    %282 = vector.extract_strided_slice %271 {offsets = [0, 64], sizes = [8, 32], strides = [1, 1]} : vector<8x128xf32> to vector<8x32xf32>
    %283 = vector.extract_strided_slice %271 {offsets = [0, 96], sizes = [8, 32], strides = [1, 1]} : vector<8x128xf32> to vector<8x32xf32>
    %cst_91 = arith.constant 5.000000e-01 : f32
    %284 = vector.broadcast %cst_91 : f32 to vector<8x32xf32>
    %285 = arith.mulf %284, %283 : vector<8x32xf32>
    %cst_92 = arith.constant 5.000000e-01 : f32
    %286 = vector.broadcast %cst_92 : f32 to vector<8x32xf32>
    %287 = arith.addf %285, %286 : vector<8x32xf32>
    %288 = arith.mulf %281, %255 : vector<8x32xf32>
    %289 = arith.mulf %276, %282 : vector<8x32xf32>
    %290 = arith.addf %288, %289 : vector<8x32xf32>
    %291 = math.tanh %290 : vector<8x32xf32>
    %292 = arith.mulf %287, %291 : vector<8x32xf32>
    %293 = arith.addi %13, %c7_i32 : i32
    %294 = vector.broadcast %293 : i32 to vector<8x1xi32>
    %295 = arith.cmpi eq, %15, %294 : vector<8x1xi32>
    %296 = vector.shape_cast %295 : vector<8x1xi1> to vector<8x1xi1>
    %297 = vector.broadcast %296 : vector<8x1xi1> to vector<8x32xi1>
    %298 = arith.select %297, %292, %263 : vector<8x32xi1>, vector<8x32xf32>
    %c8_i32_93 = arith.constant 8 : i32
    %c0_94 = arith.constant 0 : index
    %c0_95 = arith.constant 0 : index
    %299 = vector.load %arg10[%c0_94, %c0_95] : memref<8x32xf32, #tpu.memory_space<vmem>>, vector<8x32xf32>
    tpu.vector_store %arg10[%c0_94, %c0_95], %292 {strides = array<i32>} : memref<8x32xf32, #tpu.memory_space<vmem>>, vector<8x32xf32>,
    %c0_96 = arith.constant 0 : index
    %c0_97 = arith.constant 0 : index
    %300 = vector.load %arg11[%c0_96, %c0_97] : memref<8x32xf32, #tpu.memory_space<vmem>>, vector<8x32xf32>
    tpu.vector_store %arg11[%c0_96, %c0_97], %290 {strides = array<i32>} : memref<8x32xf32, #tpu.memory_space<vmem>>, vector<8x32xf32>,
    %c0_98 = arith.constant 0 : index
    %c0_99 = arith.constant 0 : index
    %301 = vector.load %arg12[%c0_98, %c0_99] : memref<8x32xf32, #tpu.memory_space<vmem>>, vector<8x32xf32>
    tpu.vector_store %arg12[%c0_98, %c0_99], %298 {strides = array<i32>} : memref<8x32xf32, #tpu.memory_space<vmem>>, vector<8x32xf32>,
    %c0_i32_100 = arith.constant 0 : i32
    %302 = arith.cmpi eq, %arg1, %c0_i32_100 : i32
    %303 = arith.extui %302 : i1 to i32
    %c0_i32_101 = arith.constant 0 : i32
    %304 = arith.cmpi ne, %303, %c0_i32_101 : i32
    scf.if %304 {
      %c0_102 = arith.constant 0 : index
      %c0_103 = arith.constant 0 : index
      %305 = vector.load %arg12[%c0_102, %c0_103] : memref<8x32xf32, #tpu.memory_space<vmem>>, vector<8x32xf32>
      %c0_104 = arith.constant 0 : index
      %c0_105 = arith.constant 0 : index
      %306 = vector.load %arg6[%c0_104, %c0_105] : memref<32x1xf32, #tpu.memory_space<vmem>>, vector<32x1xf32>
      %cst_106 = arith.constant dense<0.000000e+00> : vector<8x1xf32>
      %307 = tpu.matmul %305, %306, %cst_106 {dimension_numbers = #tpu.dot_dimension_numbers<[1], [0], [0], [1], [0, 0, 1, 1], [], []>} : vector<8x32xf32>, vector<32x1xf32>, vector<8x1xf32> -> vector<8x1xf32>
      %c0_107 = arith.constant 0 : index
      %c0_108 = arith.constant 0 : index
      %308 = vector.load %arg7[%c0_107, %c0_108] : memref<1x1xf32, #tpu.memory_space<vmem>>, vector<1x1xf32>
      %309 = vector.broadcast %308 : vector<1x1xf32> to vector<8x1xf32>
      %310 = arith.addf %307, %309 : vector<8x1xf32>
      %cst_109 = arith.constant 5.000000e-01 : f32
      %311 = vector.broadcast %cst_109 : f32 to vector<8x1xf32>
      %312 = arith.mulf %311, %310 : vector<8x1xf32>
      %313 = math.tanh %312 : vector<8x1xf32>
      %cst_110 = arith.constant 1.000000e+00 : f32
      %314 = vector.broadcast %cst_110 : f32 to vector<8x1xf32>
      %315 = arith.addf %313, %314 : vector<8x1xf32>
      %cst_111 = arith.constant 5.000000e-01 : f32
      %316 = vector.broadcast %cst_111 : f32 to vector<8x1xf32>
      %317 = arith.mulf %316, %315 : vector<8x1xf32>
      %c0_112 = arith.constant 0 : index
      %c0_113 = arith.constant 0 : index
      %318 = vector.load %arg9[%c0_112, %c0_113] : memref<8x1xf32, #tpu.memory_space<vmem>>, vector<8x1xf32>
      tpu.vector_store %arg9[%c0_112, %c0_113], %317 {strides = array<i32>} : memref<8x1xf32, #tpu.memory_space<vmem>>, vector<8x1xf32>,
    } else {
    }
    return
  }
  func.func @transform_0(%arg0: i32, %arg1: i32) -> (i32, i32, i32) {
    %c0_i32 = arith.constant 0 : i32
    %c0_i32_0 = arith.constant 0 : i32
    return %arg1, %arg0, %c0_i32 : i32, i32, i32
  }
  func.func @transform_1(%arg0: i32, %arg1: i32) -> (i32, i32) {
    %c0_i32 = arith.constant 0 : i32
    %c0_i32_0 = arith.constant 0 : i32
    %c0_i32_1 = arith.constant 0 : i32
    return %c0_i32, %c0_i32_0 : i32, i32
  }
  func.func @transform_2(%arg0: i32, %arg1: i32) -> (i32, i32) {
    %c0_i32 = arith.constant 0 : i32
    %c0_i32_0 = arith.constant 0 : i32
    %c0_i32_1 = arith.constant 0 : i32
    return %c0_i32, %c0_i32_0 : i32, i32
  }
  func.func @transform_3(%arg0: i32, %arg1: i32) -> (i32, i32) {
    %c0_i32 = arith.constant 0 : i32
    %c0_i32_0 = arith.constant 0 : i32
    %c0_i32_1 = arith.constant 0 : i32
    return %c0_i32, %c0_i32_0 : i32, i32
  }
  func.func @transform_4(%arg0: i32, %arg1: i32) -> (i32, i32) {
    %c0_i32 = arith.constant 0 : i32
    %c0_i32_0 = arith.constant 0 : i32
    %c0_i32_1 = arith.constant 0 : i32
    return %c0_i32, %c0_i32_0 : i32, i32
  }
  func.func @transform_5(%arg0: i32, %arg1: i32) -> (i32, i32) {
    %c0_i32 = arith.constant 0 : i32
    %c0_i32_0 = arith.constant 0 : i32
    %c0_i32_1 = arith.constant 0 : i32
    return %c0_i32, %c0_i32_0 : i32, i32
  }
  func.func @transform_6(%arg0: i32, %arg1: i32) -> (i32, i32) {
    %c0_i32 = arith.constant 0 : i32
    %c0_i32_0 = arith.constant 0 : i32
    return %arg0, %c0_i32 : i32, i32
  }
  func.func @transform_7(%arg0: i32, %arg1: i32) -> (i32, i32) {
    %c0_i32 = arith.constant 0 : i32
    %c0_i32_0 = arith.constant 0 : i32
    return %arg0, %c0_i32 : i32, i32
  }
}

</mosaic_0001>

<bundles_post_ra>
// kernel: tpu_custom_call.1
= control target key start
LH: loop header
LB: loop body
LE: loop exit
PB: predicated region body
PF: predicated region fallthrough
CT: control target
= control target key end

     0   :  { %s1518_s0 = inlined_call_operand.vmem [shape: bf16[8,8,32], index: 0, kind: input, shape index: {}]   ;;  %s1519_s1 = inlined_call_operand.hbm [shape: bf16[32,128], index: 1, kind: input, shape index: {}]   ;;  %s1520_s2 = inlined_call_operand.hbm [shape: bf16[32,128], index: 2, kind: input, shape index: {}]   ;;  %s1521_s3 = inlined_call_operand.vmem [shape: f32[1,128], index: 3, kind: input, shape index: {}]   ;;  %s1522_s4 = inlined_call_operand.vmem [shape: f32[32,1], index: 4, kind: input, shape index: {}]   ;;  %s1523_s5 = inlined_call_operand.<no memory space> [shape: f32[1,1], index: 5, kind: input, shape index: {}]   ;;  %s1524_s6 = inlined_call_operand.vmem [shape: s32[8,1], index: 6, kind: input, shape index: {}]   ;;  %s1525_s7 = inlined_call_operand.vmem [shape: f32[8,1], index: 7, kind: output, shape index: {}]  }
   0x1   :  { %v12_v0 = vstv %s1523_s5 }
   0x2   :  { %13 = vst [vmem:[#allocation6] sm:$0x1] %v12_v0 }
   0x3   :  { %14 = vsyncpa [#allocation8], 0 }
   0x4   :  { %15 = vsyncpa [#allocation10], 0  ;;  %s1256_s26 = smov [#allocation7]  }
   0x5   :  { %s23_s27 = sshll.u32 %s1256_s26, 4  ;;  %s24_s27 = int_to_ptr.vmem [resolvable:$true] %s23_s27 }
   0x6   :  { %s1220_s28 = scalar_lea.vmem %s24_s27, 256  ;;  %p1225_p1 = scmp.lt.s32.totalorder %s24_s27, %s24_s27 }
   0x7   :  { %p1221_p0 = scmp.ne.s32.totalorder %s24_s27, %s1220_s28  ;;  %p1226_p2 = scmp.lt.s32.totalorder %s1220_s28, %s1220_s28 }
   0x9   :  { %p1227_p3 = por %p1226_p2, %p1225_p1 }
   0xb   :  { %p1228_p4 = pnand %p1227_p3, %p1221_p0 }
   0xd   :  { %1231 = shalt.err (!%p1228_p4)
}
   0xe   :  { %s1257_s29 = smov 64   ;;  %s1258_s30 = smov 4  }
   0xf   :  { %29 = dma.hbm_to_vmem [thread:$0]  %s1519_s1, 256, %s24_s27, [#allocation8], %s1257_s29, %s1257_s29, %s1258_s30  }
  0x10   :  { %s1259_s5 = smov [#allocation9]  }
  0x11   :  { %s35_s10 = sshll.u32 %s1259_s5, 4  ;;  %s36_s10 = int_to_ptr.vmem [resolvable:$true] %s35_s10 }
  0x12   :  { %s1240_s11 = scalar_lea.vmem %s36_s10, 256  ;;  %p1245_p6 = scmp.lt.s32.totalorder %s36_s10, %s36_s10 }
  0x13   :  { %p1241_p5 = scmp.ne.s32.totalorder %s36_s10, %s1240_s11  ;;  %p1246_p7 = scmp.lt.s32.totalorder %s1240_s11, %s1240_s11 }
  0x15   :  { %p1247_p8 = por %p1246_p7, %p1245_p6 }
  0x17   :  { %p1248_p9 = pnand %p1247_p8, %p1241_p5 }
  0x19   :  { %1251 = shalt.err (!%p1248_p9)
}
  0x1a   :  { %41 = dma.hbm_to_vmem [thread:$0]  %s1520_s2, 256, %s36_s10, [#allocation10], %s1257_s29, %s1257_s29, %s1258_s30  }
  0x1b   :  { %1252 = dma.done.wait [#allocation8], 256  }
  0x1c   :  { %1253 = vsyncadd [#allocation8], 4294967040 }
  0x1d   :  { %1254 = dma.done.wait [#allocation10], 256  }
  0x1e   :  { %1255 = vsyncadd [#allocation10], 4294967040  ;;  %vm61_vm0 = vcmask 261120   ;;  %v1260_v1 = vmov 0.0   ;;  %vm1261_vm1 = vmmov 0   ;;  %v1170_v2 = vld [vmem:[#allocation7 + $0x8] sm:$0xff]  }
  0x1f   :  { %1084 = vmatprep.subr.bf16.mxu1 %v1260_v1  ;;  %62 = vst.msk [vmem:[#allocation2] sm:$0xff] %vm61_vm0, %v1260_v1  ;;  %63 = vst.msk [vmem:[#allocation3] sm:$0xff] %vm61_vm0, %v1260_v1  ;;  %1088 = vmatprep.mubr.msk.bf16.mxu1 %vm1261_vm1, %v1260_v1  ;;  %v1171_v3 = vld [vmem:[#allocation7] sm:$0xff]   ;;  %v1173_v5 = vld [vmem:[%s1518_s0 + $0x8] sm:$0xff]  }
  0x20   :  { %64 = vst.msk [vmem:[#allocation4] sm:$0xff] %vm61_vm0, %v1260_v1  ;;  %1072 = vmatprep.subr.bf16.mxu0 %v1170_v2  ;;  %v1172_v4 = vld [vmem:[%s1518_s0] sm:$0xff]   ;;  %v1334_v6 = vld [vmem:[#allocation9 + $0x8] sm:$0xff]   ;;  %v1336_v7 = vld [vmem:[#allocation9] sm:$0xff]  }
  0x21   :  { %1073 = vmatpush3.bf16.msra.mxu0 %v1170_v2  ;;  %1076 = vmatprep.mubr.msk.bf16.mxu0 %vm61_vm0, %v1172_v4  ;;  %v1358_v11 = vld [vmem:[%s1521_s3] ss:$0 sm:$0xff]  ;;  %s1262_s3 = smov 32   ;;  %v1176_v57 = vld [vmem:[%s1518_s0 + $0x10] sm:$0xff]   ;;  %v1177_v58 = vld [vmem:[%s1518_s0 + $0x18] sm:$0xff]  }
  0x22   :  { %1074 = vmatprep.subr.bf16.mxu0 %v1171_v3  ;;  %1085 = vmatpush3.bf16.msra.mxu1 %v1334_v6 }
  0x23   :  { %1086 = vmatprep.subr.bf16.mxu1 %v1260_v1 }
  0x25   :  { %1075 = vmatpush3.bf16.msra.mxu0 %v1171_v3 }
  0x26   :  { %v218_v8 = vld [vmem:[#allocation2] sm:$0xff]  ;;  %1100 = vmatprep.subr.bf16.mxu0 %v1260_v1  ;;  %1087 = vmatpush3.bf16.msra.mxu1 %v1336_v7  ;;  %v219_v29 = vld [vmem:[#allocation3] sm:$0xff] }
  0x27   :  { %v223_v9 = vpack.c.bf16 %v218_v8, %v218_v8  ;;  %1092 = vmatprep.subr.bf16.mxu1 %v1260_v1 }
  0x28   :  { %1077 = vmatmul.mubr.msk.bf16.vlgmr.msra.gmra.mxu0 %vm61_vm0, %v1173_v5 }
  0x29   :  { %1101 = vmatpush3.bf16.msra.mxu0 %v1334_v6  ;;  %1089 = vmatmul.mubr.msk.bf16.vlgmr.msra.gmra.mxu1 %vm61_vm0, %v223_v9 }
  0x2a   :  { %1102 = vmatprep.subr.bf16.mxu0 %v1260_v1  ;;  %1093 = vmatpush3.bf16.msra.mxu1 %v1334_v6 }
  0x2b   :  { %1096 = vmatprep.mubr.msk.bf16.mxu1 %vm1261_vm1, %v1260_v1  ;;  %1094 = vmatprep.subr.bf16.mxu1 %v1260_v1 }
  0x2c   :  { %1080 = vmatprep.mubr.msk.bf16.mxu0 %vm61_vm0, %v1176_v57 }
  0x2d   :  { %1103 = vmatpush3.bf16.msra.mxu0 %v1336_v7 }
  0x2e   :  { %1116 = vmatprep.subr.bf16.mxu0 %v1260_v1  ;;  %1095 = vmatpush3.bf16.msra.mxu1 %v1336_v7 }
  0x2f   :  { %1108 = vmatprep.subr.bf16.mxu1 %v1260_v1 }
  0x30   :  { %1081 = vmatmul.mubr.msk.bf16.gmra.mxu0 %vm61_vm0, %v1177_v58 }
  0x31   :  { %1104 = vmatprep.mubr.msk.bf16.mxu0 %vm1261_vm1, %v1260_v1 }
  0xe8   :  { %v1078_v10 = vpop.f32.mrf.mxu0 }
  0xe9   :  { %v273_v13 = vpop.f32.mrf.mxu1  ;;  %v174_v15 = vadd.f32 %v1078_v10, %v1358_v11 }
  0xea   :  { %v165_v12 = vpop.f32.mrf.mxu0 }
  0xeb   :  { %v1090_v17 = vpop.f32.mrf.mxu1  ;;  %v166_v19 = vadd.f32 %v1358_v11, %v165_v12 }
  0xec   :  { %v1079_v14 = vpop.f32.mrf.mxu0 }
  0xed   :  { %v177_v16 = vadd.f32 %v1079_v14, %v1358_v11  ;;  %v276_v22 = vpop.f32.mrf.mxu1 }
  0xee   :  { %v168_v18 = vpop.f32.mrf.mxu0 }
  0xef   :  { %v1022_v20 = vpack.c.bf16 %v177_v16, %v174_v15  ;;  %v169_v21 = vadd.f32 %v1358_v11, %v168_v18  ;;  %v1091_v24 = vpop.f32.mrf.mxu1 }
  0xf0   :  { %v1082_v63 = vpop.f32.mrf.mxu0 }
  0xf1   :  { %1034 = vst [vmem:[#allocation5 + $0x8] sm:$0xff] %v1022_v20   ;;  %v1017_v23 = vpack.c.bf16 %v169_v21, %v166_v19  ;;  %v190_v2 = vadd.f32 %v1082_v63, %v1358_v11 }
  0xf2   :  { %v181_v0 = vpop.f32.mrf.mxu0 }
  0xf3   :  { %1018 = vst [vmem:[#allocation5] sm:$0xff] %v1017_v23   ;;  %v182_v4 = vadd.f32 %v1358_v11, %v181_v0 }
  0xf4   :  { %v1083_v3 = vpop.f32.mrf.mxu0 }
  0xf5   :  { %v193_v5 = vadd.f32 %v1083_v3, %v1358_v11 }
  0xf6   :  { %v184_v8 = vpop.f32.mrf.mxu0 }
  0xf7   :  { %v1032_v9 = vpack.c.bf16 %v193_v5, %v190_v2  ;;  %v185_v10 = vadd.f32 %v1358_v11, %v184_v8 }
  0xf8   :  { %v397_v14 = vld [vmem:[#allocation5 + $0x8] sm:$0xff]  }
  0xf9   :  { %1036 = vst [vmem:[#allocation5 + $0x18] sm:$0xff] %v1032_v9   ;;  %v1027_v12 = vpack.c.bf16 %v185_v10, %v182_v4  ;;  %v398_v15 = vunpack.c.l.bf16 %v397_v14 }
  0xfa   :  { %v221_v25 = vld [vmem:[#allocation5] sm:$0xff]  }
  0xfb   :  { %v222_v26 = vunpack.c.l.bf16 %v221_v25  ;;  %v318_v43 = vunpack.c.h.bf16 %v221_v25  ;;  %1035 = vst [vmem:[#allocation5 + $0x10] sm:$0xff] %v1027_v12  }
  0xfd   :  { %v279_v27 = vadd.f32 %v273_v13, %v222_v26 }
  0xff   :  { %1178 = vtanh.f32 %v279_v27 }
 0x10c   :  { %v1179_v28 = vpop.eup %1178 }
 0x10d   :  { %289 = vrot.lane.b32.xlu0 %v1179_v28, %s1257_s29  ;;  %v281_v30 = vmul.f32 0.5, %v1179_v28 }
 0x10f   :  { %v282_v31 = vadd.f32 0.5, %v281_v30 }
 0x111   :  { %284 = vrot.lane.b32.xlu0 %v219_v29, %s1262_s3 }
 0x17f   :  { %v290_v32 = vpop.permute.xlu0 %289 }
 0x180   :  { %v292_v33 = vmul.f32 %v290_v32, %v282_v31 }
 0x182   :  { %294 = vrot.lane.b32.xlu1 %v292_v33, %s1262_s3  ;;  %v478_v33 = vunpack.c.h.bf16 %v397_v14 }
 0x183   :  { %v285_v34 = vpop.permute.xlu0 %284 }
 0x184   :  { %v287_v35 = vmul.f32 %v285_v34, %v282_v31 }
 0x1f4   :  { %v295_v36 = vpop.permute.xlu1 %294 }
 0x1f5   :  { %v297_v37 = vadd.f32 %v295_v36, %v287_v35 }
 0x1f7   :  { %1180 = vtanh.f32 %v297_v37 }
 0x204   :  { %v1181_v38 = vpop.eup %1180 }
 0x205   :  { %300 = vrot.lane.b32.xlu1 %v1181_v38, %s1257_s29 }
 0x277   :  { %v301_v39 = vpop.permute.xlu1 %300 }
 0x278   :  { %v1368_v40 = vmul.f32 %v301_v39, %v282_v31 }
 0x27a   :  { %v319_v41 = vpack.c.bf16 %v1368_v40, %v1368_v40 }
 0x27c   :  { %321 = vrot.lane.b32.xlu0 %v319_v41, %s1262_s3 }
 0x2ee   :  { %v322_v42 = vpop.permute.xlu0 %321 }
 0x2ef   :  { %1097 = vmatmul.mubr.msk.bf16.vlgmr.msra.gmra.mxu1 %vm61_vm0, %v322_v42 }
 0x2f0   :  { %1109 = vmatpush3.bf16.msra.mxu1 %v1334_v6  ;;  %1112 = vmatprep.mubr.msk.bf16.mxu1 %vm1261_vm1, %v1260_v1 }
 0x2f1   :  { %1110 = vmatprep.subr.bf16.mxu1 %v1260_v1 }
 0x2f4   :  { %1111 = vmatpush3.bf16.msra.mxu1 %v1336_v7 }
 0x2f5   :  { %1124 = vmatprep.subr.bf16.mxu1 %v1260_v1 }
 0x3af   :  { %v360_v44 = vpop.f32.mrf.mxu1 }
 0x3b0   :  { %v366_v45 = vadd.f32 %v360_v44, %v318_v43 }
 0x3b1   :  { %v1098_v46 = vpop.f32.mrf.mxu1 }
 0x3b2   :  { %1182 = vtanh.f32 %v366_v45 }
 0x3b3   :  { %v363_v47 = vpop.f32.mrf.mxu1 }
 0x3b5   :  { %v1099_v48 = vpop.f32.mrf.mxu1 }
 0x3bf   :  { %v1183_v49 = vpop.eup %1182 }
 0x3c0   :  { %372 = vrot.lane.b32.xlu1 %v1183_v49, %s1257_s29  ;;  %v368_v50 = vmul.f32 0.5, %v1183_v49 }
 0x3c2   :  { %v369_v51 = vadd.f32 0.5, %v368_v50 }
 0x3c4   :  { %v370_v54 = vmul.f32 %v369_v51, %v297_v37 }
 0x432   :  { %v373_v52 = vpop.permute.xlu1 %372 }
 0x433   :  { %v375_v53 = vmul.f32 %v373_v52, %v369_v51 }
 0x435   :  { %377 = vrot.lane.b32.xlu0 %v375_v53, %s1262_s3  ;;  %v557_v53 = vld [vmem:[#allocation5 + $0x10] sm:$0xff]  }
 0x436   :  { %v638_v14 = vunpack.c.h.bf16 %v557_v53 }
 0x4a7   :  { %v378_v55 = vpop.permute.xlu0 %377 }
 0x4a8   :  { %v380_v56 = vadd.f32 %v378_v55, %v370_v54  ;;  %v558_v54 = vunpack.c.l.bf16 %v557_v53 }
 0x4aa   :  { %1184 = vtanh.f32 %v380_v56 }
 0x4b7   :  { %v1185_v59 = vpop.eup %1184 }
 0x4b8   :  { %383 = vrot.lane.b32.xlu1 %v1185_v59, %s1257_s29 }
 0x52a   :  { %v384_v60 = vpop.permute.xlu1 %383 }
 0x52b   :  { %v1393_v61 = vmul.f32 %v384_v60, %v369_v51 }
 0x52d   :  { %v399_v62 = vpack.c.bf16 %v1393_v61, %v1393_v61 }
 0x52f   :  { %401 = vrot.lane.b32.xlu0 %v399_v62, %s1262_s3 }
 0x5a1   :  { %v402_v13 = vpop.permute.xlu0 %401 }
 0x5a2   :  { %1105 = vmatmul.mubr.msk.bf16.vlgmr.msra.gmra.mxu0 %vm61_vm0, %v402_v13 }
 0x5a3   :  { %1117 = vmatpush3.bf16.msra.mxu0 %v1334_v6  ;;  %1120 = vmatprep.mubr.msk.bf16.mxu0 %vm1261_vm1, %v1260_v1 }
 0x5a4   :  { %1118 = vmatprep.subr.bf16.mxu0 %v1260_v1 }
 0x5a7   :  { %1119 = vmatpush3.bf16.msra.mxu0 %v1336_v7 }
 0x5a8   :  { %1132 = vmatprep.subr.bf16.mxu0 %v1260_v1 }
 0x662   :  { %v440_v11 = vpop.f32.mrf.mxu0 }
 0x663   :  { %v446_v16 = vadd.f32 %v440_v11, %v398_v15 }
 0x664   :  { %v1106_v17 = vpop.f32.mrf.mxu0 }
 0x665   :  { %1186 = vtanh.f32 %v446_v16 }
 0x666   :  { %v443_v18 = vpop.f32.mrf.mxu0 }
 0x668   :  { %v1107_v19 = vpop.f32.mrf.mxu0 }
 0x672   :  { %v1187_v20 = vpop.eup %1186 }
 0x673   :  { %452 = vrot.lane.b32.xlu1 %v1187_v20, %s1257_s29  ;;  %v448_v21 = vmul.f32 0.5, %v1187_v20 }
 0x675   :  { %v449_v22 = vadd.f32 0.5, %v448_v21 }
 0x677   :  { %v450_v25 = vmul.f32 %v449_v22, %v380_v56 }
 0x6e5   :  { %v453_v23 = vpop.permute.xlu1 %452 }
 0x6e6   :  { %v455_v24 = vmul.f32 %v453_v23, %v449_v22 }
 0x6e8   :  { %457 = vrot.lane.b32.xlu0 %v455_v24, %s1262_s3 }
 0x75a   :  { %v458_v26 = vpop.permute.xlu0 %457 }
 0x75b   :  { %v460_v27 = vadd.f32 %v458_v26, %v450_v25 }
 0x75d   :  { %1188 = vtanh.f32 %v460_v27 }
 0x76a   :  { %v1189_v28 = vpop.eup %1188 }
 0x76b   :  { %463 = vrot.lane.b32.xlu1 %v1189_v28, %s1257_s29 }
 0x7dd   :  { %v464_v29 = vpop.permute.xlu1 %463 }
 0x7de   :  { %v1412_v30 = vmul.f32 %v464_v29, %v449_v22 }
 0x7e0   :  { %v479_v31 = vpack.c.bf16 %v1412_v30, %v1412_v30 }
 0x7e2   :  { %481 = vrot.lane.b32.xlu0 %v479_v31, %s1262_s3  ;;  %v717_v31 = vld [vmem:[#allocation5 + $0x18] sm:$0xff]  }
 0x7e3   :  { %v798_v53 = vunpack.c.h.bf16 %v717_v31 }
 0x854   :  { %v482_v32 = vpop.permute.xlu0 %481 }
 0x855   :  { %1113 = vmatmul.mubr.msk.bf16.vlgmr.msra.gmra.mxu1 %vm61_vm0, %v482_v32  ;;  %v718_v32 = vunpack.c.l.bf16 %v717_v31  ;;  %v897_v31 = vld [vmem:[%s1522_s4 + $0x10] sm:$0xff] }
 0x856   :  { %1125 = vmatpush3.bf16.msra.mxu1 %v1334_v6  ;;  %1128 = vmatprep.mubr.msk.bf16.mxu1 %vm1261_vm1, %v1260_v1 }
 0x857   :  { %1126 = vmatprep.subr.bf16.mxu1 %v1260_v1 }
 0x85a   :  { %1127 = vmatpush3.bf16.msra.mxu1 %v1336_v7 }
 0x85b   :  { %1140 = vmatprep.subr.bf16.mxu1 %v1260_v1 }
 0x915   :  { %v520_v34 = vpop.f32.mrf.mxu1 }
 0x916   :  { %v526_v35 = vadd.f32 %v520_v34, %v478_v33 }
 0x917   :  { %v1114_v36 = vpop.f32.mrf.mxu1 }
 0x918   :  { %1190 = vtanh.f32 %v526_v35 }
 0x919   :  { %v523_v37 = vpop.f32.mrf.mxu1 }
 0x91b   :  { %v1115_v38 = vpop.f32.mrf.mxu1 }
 0x925   :  { %v1191_v39 = vpop.eup %1190 }
 0x926   :  { %532 = vrot.lane.b32.xlu1 %v1191_v39, %s1257_s29  ;;  %v528_v41 = vmul.f32 0.5, %v1191_v39 }
 0x928   :  { %v529_v42 = vadd.f32 0.5, %v528_v41 }
 0x92a   :  { %v530_v45 = vmul.f32 %v529_v42, %v460_v27 }
 0x998   :  { %v533_v43 = vpop.permute.xlu1 %532 }
 0x999   :  { %v535_v44 = vmul.f32 %v533_v43, %v529_v42 }
 0x99b   :  { %537 = vrot.lane.b32.xlu0 %v535_v44, %s1262_s3 }
 0xa0d   :  { %v538_v46 = vpop.permute.xlu0 %537 }
 0xa0e   :  { %v540_v47 = vadd.f32 %v538_v46, %v530_v45 }
 0xa10   :  { %1192 = vtanh.f32 %v540_v47 }
 0xa1d   :  { %v1193_v48 = vpop.eup %1192 }
 0xa1e   :  { %543 = vrot.lane.b32.xlu1 %v1193_v48, %s1257_s29 }
 0xa90   :  { %v544_v49 = vpop.permute.xlu1 %543 }
 0xa91   :  { %v1427_v50 = vmul.f32 %v544_v49, %v529_v42 }
 0xa93   :  { %v559_v51 = vpack.c.bf16 %v1427_v50, %v1427_v50 }
 0xa95   :  { %561 = vrot.lane.b32.xlu0 %v559_v51, %s1262_s3 }
 0xb07   :  { %v562_v52 = vpop.permute.xlu0 %561 }
 0xb08   :  { %1121 = vmatmul.mubr.msk.bf16.vlgmr.msra.gmra.mxu0 %vm61_vm0, %v562_v52 }
 0xb09   :  { %1133 = vmatpush3.bf16.msra.mxu0 %v1334_v6  ;;  %1136 = vmatprep.mubr.msk.bf16.mxu0 %vm1261_vm1, %v1260_v1 }
 0xb0a   :  { %1134 = vmatprep.subr.bf16.mxu0 %v1260_v1 }
 0xb0d   :  { %1135 = vmatpush3.bf16.msra.mxu0 %v1336_v7 }
 0xb0e   :  { %1148 = vmatprep.subr.mxu0 %v1260_v1 }
 0xbc8   :  { %v600_v55 = vpop.f32.mrf.mxu0 }
 0xbc9   :  { %v606_v56 = vadd.f32 %v600_v55, %v558_v54 }
 0xbca   :  { %v1122_v57 = vpop.f32.mrf.mxu0 }
 0xbcb   :  { %1194 = vtanh.f32 %v606_v56 }
 0xbcc   :  { %v603_v58 = vpop.f32.mrf.mxu0 }
 0xbcd   :  { %v1263_v58 = vmov 0  }
 0xbce   :  { %v1123_v59 = vpop.f32.mrf.mxu0  ;;  %1168 = vset.pattern.permute.xlu1 %v1263_v58  ;;  %1169 = vset.pattern.permute.xlu0 %v1263_v58 }
 0xbcf   :  { %v217_v59 = vld [vmem:[%s1524_s6] sm:$0xff]  ;;  %s1264_s6 = smov 96  }
 0xbd0   :  { %vm389_vm2 = vcmp.eq.s32.totalorder %v217_v59, 1  ;;  %vm629_vm3 = vcmp.eq.s32.totalorder %v217_v59, 4  ;;  %vm305_vm4 = vcmp.eq.s32.totalorder %v217_v59, 0  ;;  %vm869_vm5 = vcmp.eq.s32.totalorder %v217_v59, 7 }
 0xbd1   :  { %vm469_vm6 = vcmp.eq.s32.totalorder %v217_v59, 2  ;;  %vm549_vm7 = vcmp.eq.s32.totalorder %v217_v59, 3  ;;  %vm709_vm8 = vcmp.eq.s32.totalorder %v217_v59, 5  ;;  %vm789_vm9 = vcmp.eq.s32.totalorder %v217_v59, 6 }
 0xbd8   :  { %v1195_v60 = vpop.eup %1194 }
 0xbd9   :  { %612 = vrot.lane.b32.xlu1 %v1195_v60, %s1257_s29  ;;  %v608_v62 = vmul.f32 0.5, %v1195_v60 }
 0xbdb   :  { %v609_v63 = vadd.f32 0.5, %v608_v62  ;;  %v390_v62 = vsel %vm389_vm2, 1, %v1263_v58  ;;  %vm65_vm2 = vcmask 7168  }
 0xbdc   :  { %66 = vst.msk [vmem:[%s1525_s7] sm:$0xff] %vm65_vm2, %v1260_v1 }
 0xbdd   :  { %v610_v3 = vmul.f32 %v609_v63, %v540_v47 }
 0xc4b   :  { %v613_v0 = vpop.permute.xlu1 %612 }
 0xc4c   :  { %v615_v2 = vmul.f32 %v613_v0, %v609_v63 }
 0xc4e   :  { %617 = vrot.lane.b32.xlu0 %v615_v2, %s1262_s3  ;;  %v306_v2 = vsel %vm305_vm4, 1, %v1263_v58 }
 0xcc0   :  { %v618_v4 = vpop.permute.xlu0 %617 }
 0xcc1   :  { %v620_v5 = vadd.f32 %v618_v4, %v610_v3  ;;  %v870_v3 = vsel %vm869_vm5, 1, %v1263_v58  ;;  %v470_v4 = vsel %vm469_vm6, 1, %v1263_v58 }
 0xcc3   :  { %1196 = vtanh.f32 %v620_v5 }
 0xcd0   :  { %v1197_v8 = vpop.eup %1196 }
 0xcd1   :  { %623 = vrot.lane.b32.xlu1 %v1197_v8, %s1257_s29  ;;  %v710_v8 = vsel %vm709_vm8, 1, %v1263_v58 }
 0xd43   :  { %v624_v9 = vpop.permute.xlu1 %623 }
 0xd44   :  { %v1442_v10 = vmul.f32 %v624_v9, %v609_v63  ;;  %v630_v63 = vsel %vm629_vm3, 1, %v1263_v58  ;;  %v790_v9 = vsel %vm789_vm9, 1, %v1263_v58 }
 0xd46   :  { %v639_v12 = vpack.c.bf16 %v1442_v10, %v1442_v10 }
 0xd48   :  { %641 = vrot.lane.b32.xlu0 %v639_v12, %s1262_s3 }
 0xdba   :  { %v642_v13 = vpop.permute.xlu0 %641 }
 0xdbb   :  { %1129 = vmatmul.mubr.msk.bf16.vlgmr.msra.gmra.mxu1 %vm61_vm0, %v642_v13 }
 0xdbc   :  { %1141 = vmatpush3.bf16.msra.mxu1 %v1334_v6  ;;  %1144 = vmatprep.mubr.msk.bf16.mxu1 %vm1261_vm1, %v1260_v1 }
 0xdbd   :  { %1142 = vmatprep.subr.bf16.mxu1 %v1260_v1 }
 0xdc0   :  { %1143 = vmatpush3.bf16.msra.mxu1 %v1336_v7 }
 0xe7b   :  { %v680_v15 = vpop.f32.mrf.mxu1 }
 0xe7c   :  { %v686_v11 = vadd.f32 %v680_v15, %v638_v14 }
 0xe7d   :  { %v1130_v16 = vpop.f32.mrf.mxu1 }
 0xe7e   :  { %1198 = vtanh.f32 %v686_v11  ;;  %v220_v11 = vld [vmem:[#allocation4] sm:$0xff] }
 0xe7f   :  { %v683_v17 = vpop.f32.mrf.mxu1 }
 0xe81   :  { %v1131_v18 = vpop.f32.mrf.mxu1 }
 0xe8b   :  { %v1199_v19 = vpop.eup %1198 }
 0xe8c   :  { %692 = vrot.lane.b32.xlu1 %v1199_v19, %s1257_s29  ;;  %v688_v20 = vmul.f32 0.5, %v1199_v19 }
 0xe8e   :  { %v689_v21 = vadd.f32 0.5, %v688_v20 }
 0xe90   :  { %v690_v23 = vmul.f32 %v689_v21, %v620_v5  ;;  %v550_v5 = vsel %vm549_vm7, 1, %v1263_v58 }
 0xefe   :  { %v693_v6 = vpop.permute.xlu1 %692 }
 0xeff   :  { %v695_v22 = vmul.f32 %v693_v6, %v689_v21 }
 0xf01   :  { %697 = vrot.lane.b32.xlu0 %v695_v22, %s1262_s3 }
 0xf73   :  { %v698_v24 = vpop.permute.xlu0 %697 }
 0xf74   :  { %v700_v25 = vadd.f32 %v698_v24, %v690_v23 }
 0xf76   :  { %1200 = vtanh.f32 %v700_v25 }
 0xf83   :  { %v1201_v7 = vpop.eup %1200 }
 0xf84   :  { %703 = vrot.lane.b32.xlu1 %v1201_v7, %s1257_s29 }
 0xff6   :  { %v704_v26 = vpop.permute.xlu1 %703 }
 0xff7   :  { %v1456_v27 = vmul.f32 %v704_v26, %v689_v21 }
 0xff9   :  { %v719_v28 = vpack.c.bf16 %v1456_v27, %v1456_v27 }
 0xffb   :  { %721 = vrot.lane.b32.xlu0 %v719_v28, %s1262_s3 }
0x106d   :  { %v722_v29 = vpop.permute.xlu0 %721 }
0x106e   :  { %1137 = vmatmul.mubr.msk.bf16.vlgmr.msra.gmra.mxu0 %vm61_vm0, %v722_v29  ;;  %v898_v29 = vld [vmem:[%s1522_s4 + $0x18] sm:$0xff] }
0x106f   :  { %1156 = vmatprep.mubr.msk.f32.mxu0 %vm1261_vm1, %v1260_v1  ;;  %1149 = vmatpush3.msra.mxu0 %v898_v29 }
0x1070   :  { %1150 = vmatprep.subr.mxu0 %v1260_v1 }
0x1071   :  { %1151 = vmatpush3.msra.mxu0 %v897_v31 }
0x1072   :  { %1152 = vmatprep.subr.mxu0 %v1260_v1 }
0x112e   :  { %v760_v33 = vpop.f32.mrf.mxu0 }
0x112f   :  { %v766_v34 = vadd.f32 %v760_v33, %v718_v32 }
0x1130   :  { %v1138_v35 = vpop.f32.mrf.mxu0 }
0x1131   :  { %1202 = vtanh.f32 %v766_v34 }
0x1132   :  { %v763_v36 = vpop.f32.mrf.mxu0 }
0x1134   :  { %v1139_v37 = vpop.f32.mrf.mxu0 }
0x113e   :  { %v1203_v38 = vpop.eup %1202 }
0x113f   :  { %772 = vrot.lane.b32.xlu1 %v1203_v38, %s1257_s29  ;;  %v768_v39 = vmul.f32 0.5, %v1203_v38 }
0x1141   :  { %v769_v41 = vadd.f32 0.5, %v768_v39 }
0x1143   :  { %v770_v44 = vmul.f32 %v769_v41, %v700_v25 }
0x11b1   :  { %v773_v42 = vpop.permute.xlu1 %772 }
0x11b2   :  { %v775_v43 = vmul.f32 %v773_v42, %v769_v41 }
0x11b4   :  { %777 = vrot.lane.b32.xlu0 %v775_v43, %s1262_s3 }
0x1226   :  { %v778_v45 = vpop.permute.xlu0 %777 }
0x1227   :  { %v780_v46 = vadd.f32 %v778_v45, %v770_v44 }
0x1229   :  { %1204 = vtanh.f32 %v780_v46 }
0x1236   :  { %v1205_v47 = vpop.eup %1204 }
0x1237   :  { %783 = vrot.lane.b32.xlu1 %v1205_v47, %s1257_s29 }
0x12a9   :  { %v784_v48 = vpop.permute.xlu1 %783 }
0x12aa   :  { %v1467_v49 = vmul.f32 %v784_v48, %v769_v41  ;;  %v1012_v41 = vld [vmem:[#allocation6] ss:$0 sm:$0xff] }
0x12ac   :  { %v799_v51 = vpack.c.bf16 %v1467_v49, %v1467_v49 }
0x12ae   :  { %801 = vrot.lane.b32.xlu0 %v799_v51, %s1262_s3 }
0x1320   :  { %v802_v52 = vpop.permute.xlu0 %801 }
0x1321   :  { %1145 = vmatmul.mubr.msk.bf16.vlgmr.msra.gmra.mxu1 %vm61_vm0, %v802_v52 }
0x13e1   :  { %v840_v54 = vpop.f32.mrf.mxu1 }
0x13e2   :  { %v846_v55 = vadd.f32 %v840_v54, %v798_v53 }
0x13e3   :  { %v1146_v56 = vpop.f32.mrf.mxu1 }
0x13e4   :  { %1206 = vtanh.f32 %v846_v55 }
0x13e5   :  { %v843_v57 = vpop.f32.mrf.mxu1 }
0x13e7   :  { %v1147_v60 = vpop.f32.mrf.mxu1 }
0x13f1   :  { %v1207_v0 = vpop.eup %1206 }
0x13f2   :  { %852 = vrot.lane.b32.xlu1 %v1207_v0, %s1257_s29  ;;  %v848_v12 = vmul.f32 0.5, %v1207_v0 }
0x13f4   :  { %v849_v13 = vadd.f32 0.5, %v848_v12 }
0x13f6   :  { %308 = vperm.xlu1 %1168, %v306_v2   ;;  %v850_v16 = vmul.f32 %v849_v13, %v780_v46 }
0x13fa   :  { %472 = vperm.xlu1 %1168, %v470_v4  }
0x13fe   :  { %552 = vperm.xlu1 %1168, %v550_v5  }
0x1402   :  { %712 = vperm.xlu1 %1168, %v710_v8  }
0x1406   :  { %792 = vperm.xlu1 %1168, %v790_v9  }
0x1464   :  { %v853_v14 = vpop.permute.xlu1 %852 }
0x1465   :  { %v855_v15 = vmul.f32 %v853_v14, %v849_v13 }
0x1467   :  { %857 = vrot.lane.b32.xlu0 %v855_v15, %s1262_s3 }
0x146b   :  { %392 = vperm.xlu0 %1169, %v390_v62  }
0x146f   :  { %632 = vperm.xlu0 %1169, %v630_v63  }
0x1471   :  { %v309_v21 = vpop.permute.xlu1 %308 }
0x1472   :  { %vm310_vm10 = vcmp.eq.s32.totalorder %v309_v21, 1 }
0x1473   :  { %312 = vrot.lane.b32.xlu0 %v220_v11, %s1264_s6 }
0x1475   :  { %v473_v22 = vpop.permute.xlu1 %472 }
0x1476   :  { %vm474_vm12 = vcmp.eq.s32.totalorder %v473_v22, 1 }
0x1477   :  { %872 = vperm.xlu0 %1169, %v870_v3  }
0x1479   :  { %v553_v24 = vpop.permute.xlu1 %552 }
0x147a   :  { %vm554_vm13 = vcmp.eq.s32.totalorder %v553_v24, 1 }
0x147d   :  { %v713_v28 = vpop.permute.xlu1 %712 }
0x147e   :  { %vm714_vm15 = vcmp.eq.s32.totalorder %v713_v28, 1 }
0x1481   :  { %v793_v33 = vpop.permute.xlu1 %792 }
0x1482   :  { %vm794_vm1 = vcmp.eq.s32.totalorder %v793_v33, 1 }
0x14d9   :  { %v858_v17 = vpop.permute.xlu0 %857 }
0x14da   :  { %v860_v18 = vadd.f32 %v858_v17, %v850_v16 }
0x14dc   :  { %1208 = vtanh.f32 %v860_v18 }
0x14e6   :  { %v393_v20 = vpop.permute.xlu0 %392 }
0x14e7   :  { %vm394_vm11 = vcmp.eq.s32.totalorder %v393_v20, 1 }
0x14e9   :  { %v1209_v19 = vpop.eup %1208 }
0x14ea   :  { %863 = vrot.lane.b32.xlu1 %v1209_v19, %s1257_s29  ;;  %v633_v6 = vpop.permute.xlu0 %632 }
0x14eb   :  { %vm634_vm14 = vcmp.eq.s32.totalorder %v633_v6, 1 }
0x14ee   :  { %v313_v23 = vpop.permute.xlu0 %312 }
0x14ef   :  { %v315_v25 = vsel %vm310_vm10, %v1368_v40, %v313_v23  ;;  %v896_v40 = vld [vmem:[%s1522_s4 + $0x8] sm:$0xff] }
0x14f0   :  { %v395_v7 = vsel %vm394_vm11, %v1393_v61, %v315_v25  ;;  %v895_v61 = vld [vmem:[%s1522_s4] sm:$0xff]  ;;  %1153 = vmatpush3.msra.mxu0 %v896_v40 }
0x14f1   :  { %v475_v26 = vsel %vm474_vm12, %v1412_v30, %v395_v7  ;;  %1154 = vmatprep.subr.mxu0 %v1260_v1 }
0x14f2   :  { %v555_v32 = vsel %vm554_vm13, %v1427_v50, %v475_v26  ;;  %1155 = vmatpush3.msra.mxu0 %v895_v61  ;;  %v873_v34 = vpop.permute.xlu0 %872 }
0x14f3   :  { %v635_v30 = vsel %vm634_vm14, %v1442_v10, %v555_v32  ;;  %vm874_vm3 = vcmp.eq.s32.totalorder %v873_v34, 1 }
0x14f4   :  { %v715_v50 = vsel %vm714_vm15, %v1456_v27, %v635_v30 }
0x14f5   :  { %v795_v10 = vsel %vm794_vm1, %v1467_v49, %v715_v50 }
0x155c   :  { %v864_v35 = vpop.permute.xlu1 %863 }
0x155d   :  { %v866_v36 = vmul.f32 %v864_v35, %v849_v13 }
0x155f   :  { %877 = vrot.lane.b32.xlu1 %v866_v36, %s1262_s3  ;;  %v875_v37 = vsel %vm874_vm3, %v866_v36, %v795_v10 }
0x1560   :  { %887 = vrot.lane.b32.xlu0 %v875_v37, %s1262_s3 }
0x1564   :  { %882 = vrot.lane.b32.xlu0 %v860_v18, %s1264_s6 }
0x15d1   :  { %v878_v27 = vpop.permute.xlu1 %877 }
0x15d2   :  { %880 = vst.msk [vmem:[#allocation2] sm:$0xff] %vm61_vm0, %v878_v27  ;;  %v888_v38 = vpop.permute.xlu0 %887 }
0x15d3   :  { %890 = vst.msk [vmem:[#allocation4] sm:$0xff] %vm61_vm0, %v888_v38 }
0x15d6   :  { %v883_v39 = vpop.permute.xlu0 %882 }
0x15d7   :  { %885 = vst.msk [vmem:[#allocation3] sm:$0xff] %vm61_vm0, %v883_v39 }
0x15da   :  { %v894_v1 = vld [vmem:[#allocation4] sm:$0xff] }
0x15db   :  { %1157 = vmatmul.mubr.msk.f32.vlgmr.msra.gmra.mxu0 %vm61_vm0, %v894_v1 }
0x169b   :  { %v975_v42 = vpop.f32.mrf.mxu0 }
0x169c   :  { %v976_v43 = vadd.f32 %v1012_v41, %v975_v42 }
0x169d   :  { %v1158_v44 = vpop.f32.mrf.mxu0 }
0x169e   :  { %v979_v45 = vmul.f32 0.5, %v976_v43 }
0x16a0   :  { %1210 = vtanh.f32 %v979_v45 }
0x16ad   :  { %v1211_v46 = vpop.eup %1210 }
0x16ae   :  { %v981_v47 = vadd.f32 1.0, %v1211_v46 }
0x16b0   :  { %v982_v48 = vmul.f32 0.5, %v981_v47 }
0x16b2   :  { %984 = vst.msk [vmem:[%s1525_s7] sm:$0xff] %vm65_vm2, %v982_v48 }
0x16b3   :  { %989 = vsyncpa [#allocation8], 1 }
0x16b4   :  { %990 = vsyncpa [#allocation10], 1 }

</bundles_post_ra>
